<compile_context>
chip_gen: v7x
topology: tpu7x:2x2x1
jax: 0.10.0
libtpu: 0.0.40
codegen_flags: <defaults>
</compile_context>

<pallas_src>
import functools

import jax
import jax.numpy as jnp
from jax.experimental import pallas as pl
from jax.experimental.pallas import tpu as pltpu


# --------------------------- in-kernel helpers ------------------------------ #
def _layernorm(v, w, b, eps=1e-5):
    mu = jnp.mean(v, axis=-1, keepdims=True)
    var = jnp.mean((v - mu) ** 2, axis=-1, keepdims=True)
    return (v - mu) * jax.lax.rsqrt(var + eps) * w + b


def _vmem_limit_bytes():
    """Generation-aware scoped-VMEM cap (v7x has 64 MiB, v5e/v6e have 128 MiB)."""
    cap = 64 * 1024 * 1024
    try:
        info = pltpu.get_tpu_info()
        cap = int(getattr(info, "vmem_capacity_bytes", cap))
    except Exception:
        pass
    return min(int(cap * 0.8), 100 * 1024 * 1024)


# -------------- per-layer TransformerMapper kernel (one grid step) ---------- #
def _mapper_layer_kernel(
    seq_ref,                 # (B*N, D) f32 -- only read at layer 0
    ln1w_ref, ln1b_ref,      # (1, D) f32
    wqkv_ref,                # (D, 3D) bf16  [q | k | v], each D-wide, (H, hd)-ordered
    wp_ref,                  # (H, hd, D) bf16 (head-major project weight)
    bp_ref,                  # (1, D) f32 (project bias)
    ln2w_ref, ln2b_ref,      # (1, D) f32
    w1_ref, b1_ref,          # (D, Hm) bf16, (1, Hm) f32
    w2_ref, b2_ref,          # (Hm, D) bf16, (1, D) f32
    o_ref,                   # (B*N, D) f32 -- VMEM-resident residual across layers
    *, num_heads, head_dim, batch, seq_len,
):
    D = num_heads * head_dim
    scale = head_dim ** -0.5
    rows = batch * seq_len

    # Initialize the resident residual from the (aliased) input at the first layer.
    @pl.when(pl.program_id(0) == 0)
    def _():
        o_ref[...] = seq_ref[...]

    x = o_ref[...]                                              # (R, D) f32 residual

    # ---- pre-norm multi-head self-attention (q/kv bias=False, project bias=True) ----
    xn = _layernorm(x, ln1w_ref[...], ln1b_ref[...]).astype(jnp.bfloat16)
    # Fused QKV projection: one lane-dense MXU matmul over all B*N rows.
    qkv = jnp.dot(xn, wqkv_ref[...], preferred_element_type=jnp.float32)   # (R, 3D) f32
    qkv = qkv.reshape(batch, seq_len, 3 * D)

    attn = jnp.zeros((rows, D), jnp.float32)
    for h in range(num_heads):       # static, num_heads == 8; tiny per-head matmuls
        lo = h * head_dim
        q = qkv[:, :, lo:lo + head_dim].astype(jnp.bfloat16)               # (B, N, hd)
        k = qkv[:, :, D + lo:D + lo + head_dim].astype(jnp.bfloat16)       # (B, M, hd)
        v = qkv[:, :, 2 * D + lo:2 * D + lo + head_dim].astype(jnp.bfloat16)
        # scores over keys (== einsum('bnhd,bmhd->bnmh') of the reference, per head)
        s = jax.lax.dot_general(q, k, (((2,), (2,)), ((0,), (0,))),
                                preferred_element_type=jnp.float32) * scale  # (B, N, M)
        s = s - jnp.max(s, axis=-1, keepdims=True)
        p = jnp.exp(s)                                                       # f32 softmax
        p = p * pl.reciprocal(jnp.sum(p, axis=-1, keepdims=True), approx=True)
        oh = jax.lax.dot_general(p.astype(jnp.bfloat16), v,
                                 (((2,), (1,)), ((0,), (0,))),
                                 preferred_element_type=jnp.float32)         # (B, N, hd)
        # Accumulate the output projection head-by-head: lane-dense (R, D) output,
        # no concat of per-head slices needed.
        attn = attn + jnp.dot(oh.reshape(rows, head_dim).astype(jnp.bfloat16),
                              wp_ref[h], preferred_element_type=jnp.float32)
    x = x + attn + bp_ref[...]

    # ---- pre-norm MLP (ReLU, mlp_ratio=2.0, dropout=0 -> no-op) ----
    xn2 = _layernorm(x, ln2w_ref[...], ln2b_ref[...]).astype(jnp.bfloat16)
    h1 = jnp.dot(xn2, w1_ref[...], preferred_element_type=jnp.float32) + b1_ref[...]
    h1 = jnp.maximum(h1, 0.0).astype(jnp.bfloat16)
    h2 = jnp.dot(h1, w2_ref[...], preferred_element_type=jnp.float32) + b2_ref[...]
    x = x + h2

    o_ref[...] = x


def _layer_weight_spec(stacked):
    """BlockSpec that streams one layer's slab per grid step (layer dim squeezed)."""
    tail = tuple(stacked.shape[1:])
    zeros = (0,) * len(tail)
    return pl.BlockSpec((pl.Squeezed(),) + tail, lambda l: (l,) + zeros)


def transformer_mapper(seq_flat, w, *, batch, seq_len, num_heads):
    """seq_flat: (B*N, D) f32; w: per-layer weights stacked on a leading layer axis."""
    R, D = seq_flat.shape
    assert R == batch * seq_len
    L = w["wqkv"].shape[0]
    hd = D // num_heads

    act_spec = pl.BlockSpec((R, D), lambda l: (0, 0))   # same block every layer -> resident

    grid_spec = pltpu.PrefetchScalarGridSpec(
        num_scalar_prefetch=0,
        grid=(L,),
        in_specs=[
            act_spec,
            _layer_weight_spec(w["ln1_w"]), _layer_weight_spec(w["ln1_b"]),
            _layer_weight_spec(w["wqkv"]),
            _layer_weight_spec(w["wp"]), _layer_weight_spec(w["bp"]),
            _layer_weight_spec(w["ln2_w"]), _layer_weight_spec(w["ln2_b"]),
            _layer_weight_spec(w["w1"]), _layer_weight_spec(w["b1"]),
            _layer_weight_spec(w["w2"]), _layer_weight_spec(w["b2"]),
        ],
        out_specs=act_spec,
    )
    kern = functools.partial(
        _mapper_layer_kernel,
        num_heads=num_heads, head_dim=hd, batch=batch, seq_len=seq_len,
    )
    return pl.pallas_call(
        kern,
        out_shape=jax.ShapeDtypeStruct((R, D), jnp.float32),
        grid_spec=grid_spec,
        input_output_aliases={0: 0},     # residual input aliases the output buffer
        compiler_params=pltpu.CompilerParams(
            dimension_semantics=("arbitrary",),          # layers are sequential
            vmem_limit_bytes=_vmem_limit_bytes(),
        ),
    )(
        seq_flat,
        w["ln1_w"], w["ln1_b"],
        w["wqkv"], w["wp"], w["bp"],
        w["ln2_w"], w["ln2_b"],
        w["w1"], w["b1"], w["w2"], w["b2"],
    )


# ------------------------------ parameters --------------------------------- #
def init_params(key, *, vocab, dim_clip, dim_emb, prefix_length, clip_length,
                num_layers, num_heads, mlp_ratio=2.0):
    D = dim_emb
    Hm = int(dim_emb * mlp_ratio)
    hd = D // num_heads
    keys = jax.random.split(key, 4 + num_layers)

    def nrm(k, shape, s=0.02):
        return jax.random.normal(k, shape, jnp.float32) * s

    params = {
        "embed_table": nrm(keys[0], (vocab, dim_emb)),                   # synthetic gpt embeddings
        "map_lin_w": nrm(keys[1], (dim_clip, clip_length * dim_emb)),    # clip_project.linear
        "map_lin_b": nrm(keys[2], (clip_length * dim_emb,)),
        "prefix_const": jax.random.normal(keys[3], (prefix_length, dim_emb), jnp.float32),
    }

    # Per-layer weights in (in, out) convention; q/k/v fused into one (D, 3D) matrix
    # whose column blocks are each ordered (H, hd), matching the reference reshapes.
    stacks = {k: [] for k in ("ln1_w", "ln1_b", "wqkv", "wp", "bp",
                              "ln2_w", "ln2_b", "w1", "b1", "w2", "b2")}
    for i in range(num_layers):
        lk = jax.random.split(keys[4 + i], 8)
        wq = nrm(lk[0], (D, D))                 # to_queries (bias=False)
        wkv = nrm(lk[1], (D, 2 * D))            # to_keys_values: output dim laid out (2, H, hd)
        wp = nrm(lk[2], (D, D))                 # project (bias=True), input dim laid out (H, hd)
        stacks["ln1_w"].append(jnp.ones((1, D), jnp.float32))
        stacks["ln1_b"].append(jnp.zeros((1, D), jnp.float32))
        stacks["wqkv"].append(jnp.concatenate([wq, wkv[:, :D], wkv[:, D:]], axis=1))  # (D, 3D)
        stacks["wp"].append(wp.reshape(num_heads, hd, D))                             # (H, hd, D)
        stacks["bp"].append(nrm(lk[3], (1, D)))
        stacks["ln2_w"].append(jnp.ones((1, D), jnp.float32))
        stacks["ln2_b"].append(jnp.zeros((1, D), jnp.float32))
        stacks["w1"].append(nrm(lk[4], (D, Hm)))
        stacks["b1"].append(nrm(lk[5], (1, Hm)))
        stacks["w2"].append(nrm(lk[6], (Hm, D)))
        stacks["b2"].append(nrm(lk[7], (1, D)))

    bf16_keys = {"wqkv", "wp", "w1", "w2"}      # MXU operands stored bf16
    params["stacked"] = {
        k: jnp.stack(v).astype(jnp.bfloat16) if k in bf16_keys else jnp.stack(v)
        for k, v in stacks.items()
    }
    return params


# ------------------------------- forward ------------------------------------ #
def altogether_forward(tokens, prefix, params, *, prefix_length, clip_length, num_heads):
    B = tokens.shape[0]
    D = params["embed_table"].shape[1]
    N = clip_length + prefix_length

    # gpt.get_input_embeddings()(tokens) -- embedding gather is glue
    embedding_text = jnp.take(params["embed_table"], tokens, axis=0)       # (B, T, D)

    # clip_project.linear + prefix_const concat: tiny glue, left to XLA at toy size.
    x = prefix @ params["map_lin_w"] + params["map_lin_b"]                 # (B, CL*D)
    x = x.reshape(B, clip_length, D)
    pre = jnp.broadcast_to(params["prefix_const"][None], (B, prefix_length, D))
    seq = jnp.concatenate([x, pre], axis=1).reshape(B * N, D)              # (B*N, D)

    # clip_project.transformer: one Pallas call, layer index as the grid axis.
    seq = transformer_mapper(seq, params["stacked"],
                             batch=B, seq_len=N, num_heads=num_heads)
    prefix_projections = seq.reshape(B, N, D)[:, clip_length:]             # (B, P, D)

    embedding_cat = jnp.concatenate([prefix_projections, embedding_text], axis=1)
    # TODO(synk): self.gpt(inputs_embeds=embedding_cat, ...) — pretrained OPT decoder,
    # no clean Pallas equivalent without its checkpoint; returning inputs_embeds.
    return embedding_cat


# --------------------------------- main ------------------------------------- #
if __name__ == "__main__":
    B, T = 2, 8
    VOCAB = 64
    DIM_CLIP = 32        # clip_emb_size
    DIM_EMB = 32         # gpt_embedding_size
    PREFIX_LEN = 8
    CLIP_LEN = 8
    NUM_LAYERS = 2
    NUM_HEADS = 8        # fixed to 8 in TransformerMapper

    key = jax.random.PRNGKey(0)
    kp, kt, kx = jax.random.split(key, 3)
    params = init_params(
        kp, vocab=VOCAB, dim_clip=DIM_CLIP, dim_emb=DIM_EMB,
        prefix_length=PREFIX_LEN, clip_length=CLIP_LEN,
        num_layers=NUM_LAYERS, num_heads=NUM_HEADS,
    )
    tokens = jax.random.randint(kt, (B, T), 0, VOCAB)
    prefix = jax.random.normal(kx, (B, DIM_CLIP), jnp.float32)

    fwd = jax.jit(functools.partial(
        altogether_forward,
        prefix_length=PREFIX_LEN, clip_length=CLIP_LEN, num_heads=NUM_HEADS,
    ))
    out = fwd(tokens, prefix, params)
    jax.block_until_ready(out)
    assert out.shape == (B, PREFIX_LEN + T, DIM_EMB), out.shape
    assert bool(jnp.all(jnp.isfinite(out))), "non-finite values in output"
    print("KERNEL_OK")
</pallas_src>

<mosaic_0001>
module attributes {stable_mosaic.version = 11 : i64} {
  func.func @_mapper_layer_kernel(%arg0: i32, %arg1: memref<32x32xf32, #tpu.memory_space<vmem>>, %arg2: memref<1x1x32xf32, #tpu.memory_space<vmem>>, %arg3: memref<1x1x32xf32, #tpu.memory_space<vmem>>, %arg4: memref<1x32x96xbf16, #tpu.memory_space<vmem>>, %arg5: memref<1x8x4x32xbf16, #tpu.memory_space<vmem>>, %arg6: memref<1x1x32xf32, #tpu.memory_space<vmem>>, %arg7: memref<1x1x32xf32, #tpu.memory_space<vmem>>, %arg8: memref<1x1x32xf32, #tpu.memory_space<vmem>>, %arg9: memref<1x32x64xbf16, #tpu.memory_space<vmem>>, %arg10: memref<1x1x64xf32, #tpu.memory_space<vmem>>, %arg11: memref<1x64x32xbf16, #tpu.memory_space<vmem>>, %arg12: memref<1x1x32xf32, #tpu.memory_space<vmem>>, %arg13: memref<32x32xf32, #tpu.memory_space<vmem>>) attributes {dimension_semantics = [#tpu.dimension_semantics<arbitrary>], iteration_bounds = array<i64: 2>, scalar_prefetch = 0 : i64, scratch_operands = 0 : i64, tpu.core_type = #tpu.core_type<tc>, window_params = [{pipeline_mode = #tpu.pipeline_mode<synchronous>, transform_indices = @transform_0, window_bounds = array<i64: 32, 32>}, {transform_indices = @transform_1, window_bounds = array<i64: 1, 1, 32>}, {transform_indices = @transform_2, window_bounds = array<i64: 1, 1, 32>}, {transform_indices = @transform_3, window_bounds = array<i64: 1, 32, 96>}, {transform_indices = @transform_4, window_bounds = array<i64: 1, 8, 4, 32>}, {transform_indices = @transform_5, window_bounds = array<i64: 1, 1, 32>}, {transform_indices = @transform_6, window_bounds = array<i64: 1, 1, 32>}, {transform_indices = @transform_7, window_bounds = array<i64: 1, 1, 32>}, {transform_indices = @transform_8, window_bounds = array<i64: 1, 32, 64>}, {transform_indices = @transform_9, window_bounds = array<i64: 1, 1, 64>}, {transform_indices = @transform_10, window_bounds = array<i64: 1, 64, 32>}, {transform_indices = @transform_11, window_bounds = array<i64: 1, 1, 32>}, {pipeline_mode = #tpu.pipeline_mode<synchronous>, transform_indices = @transform_12, window_bounds = array<i64: 32, 32>}]} {
    %c0_i32 = arith.constant 0 : i32
    %0 = arith.cmpi eq, %arg0, %c0_i32 : i32
    %1 = arith.extui %0 : i1 to i32
    %c0_i32_0 = arith.constant 0 : i32
    %2 = arith.cmpi ne, %1, %c0_i32_0 : i32
    scf.if %2 {
      %c0_121 = arith.constant 0 : index
      %c0_122 = arith.constant 0 : index
      %303 = vector.load %arg1[%c0_121, %c0_122] : memref<32x32xf32, #tpu.memory_space<vmem>>, vector<32x32xf32>
      %c0_123 = arith.constant 0 : index
      %c0_124 = arith.constant 0 : index
      %304 = vector.load %arg13[%c0_123, %c0_124] : memref<32x32xf32, #tpu.memory_space<vmem>>, vector<32x32xf32>
      tpu.vector_store %arg13[%c0_123, %c0_124], %303 {strides = array<i32>} : memref<32x32xf32, #tpu.memory_space<vmem>>, vector<32x32xf32>,
    } else {
    }
    %c0 = arith.constant 0 : index
    %c0_1 = arith.constant 0 : index
    %3 = vector.load %arg13[%c0, %c0_1] : memref<32x32xf32, #tpu.memory_space<vmem>>, vector<32x32xf32>
    %c0_2 = arith.constant 0 : index
    %c0_3 = arith.constant 0 : index
    %c0_4 = arith.constant 0 : index
    %4 = vector.load %arg2[%c0_2, %c0_3, %c0_4] : memref<1x1x32xf32, #tpu.memory_space<vmem>>, vector<1x1x32xf32>
    %5 = vector.shape_cast %4 : vector<1x1x32xf32> to vector<1x32xf32>
    %c0_5 = arith.constant 0 : index
    %c0_6 = arith.constant 0 : index
    %c0_7 = arith.constant 0 : index
    %6 = vector.load %arg3[%c0_5, %c0_6, %c0_7] : memref<1x1x32xf32, #tpu.memory_space<vmem>>, vector<1x1x32xf32>
    %7 = vector.shape_cast %6 : vector<1x1x32xf32> to vector<1x32xf32>
    %cst = arith.constant dense<0.000000e+00> : vector<32xf32>
    %8 = vector.multi_reduction <add>, %3, %cst [1] : vector<32x32xf32> to vector<32xf32>
    %9 = vector.shape_cast %8 : vector<32xf32> to vector<32x1xf32>
    %cst_8 = arith.constant 3.200000e+01 : f32
    %10 = vector.broadcast %cst_8 : f32 to vector<32x1xf32>
    %11 = arith.divf %9, %10 : vector<32x1xf32>
    %12 = vector.broadcast %11 : vector<32x1xf32> to vector<32x32xf32>
    %13 = arith.subf %3, %12 : vector<32x32xf32>
    %14 = arith.mulf %13, %13 : vector<32x32xf32>
    %cst_9 = arith.constant dense<0.000000e+00> : vector<32xf32>
    %15 = vector.multi_reduction <add>, %14, %cst_9 [1] : vector<32x32xf32> to vector<32xf32>
    %16 = vector.shape_cast %15 : vector<32xf32> to vector<32x1xf32>
    %cst_10 = arith.constant 3.200000e+01 : f32
    %17 = vector.broadcast %cst_10 : f32 to vector<32x1xf32>
    %18 = arith.divf %16, %17 : vector<32x1xf32>
    %19 = vector.broadcast %11 : vector<32x1xf32> to vector<32x32xf32>
    %20 = arith.subf %3, %19 : vector<32x32xf32>
    %cst_11 = arith.constant 9.99999974E-6 : f32
    %21 = vector.broadcast %cst_11 : f32 to vector<32x1xf32>
    %22 = arith.addf %18, %21 : vector<32x1xf32>
    %23 = math.rsqrt %22 : vector<32x1xf32>
    %24 = vector.broadcast %23 : vector<32x1xf32> to vector<32x32xf32>
    %25 = arith.mulf %20, %24 : vector<32x32xf32>
    %26 = vector.broadcast %5 : vector<1x32xf32> to vector<32x32xf32>
    %27 = arith.mulf %25, %26 : vector<32x32xf32>
    %28 = vector.broadcast %7 : vector<1x32xf32> to vector<32x32xf32>
    %29 = arith.addf %27, %28 : vector<32x32xf32>
    %30 = arith.truncf %29 : vector<32x32xf32> to vector<32x32xbf16>
    %c0_12 = arith.constant 0 : index
    %c0_13 = arith.constant 0 : index
    %c0_14 = arith.constant 0 : index
    %31 = vector.load %arg4[%c0_12, %c0_13, %c0_14] : memref<1x32x96xbf16, #tpu.memory_space<vmem>>, vector<1x32x96xbf16>
    %32 = vector.shape_cast %31 : vector<1x32x96xbf16> to vector<32x96xbf16>
    %cst_15 = arith.constant dense<0.000000e+00> : vector<32x96xf32>
    %33 = tpu.matmul %30, %32, %cst_15 {dimension_numbers = #tpu.dot_dimension_numbers<[1], [0], [0], [1], [0, 0, 1, 1], [], []>} : vector<32x32xbf16>, vector<32x96xbf16>, vector<32x96xf32> -> vector<32x96xf32>
    %34 = vector.shape_cast %33 : vector<32x96xf32> to vector<2x16x96xf32>
    %cst_16 = arith.constant 0.000000e+00 : f32
    %35 = vector.broadcast %cst_16 : f32 to vector<32x32xf32>
    %36 = vector.extract_strided_slice %34 {offsets = [0, 0, 0], sizes = [2, 16, 4], strides = [1, 1, 1]} : vector<2x16x96xf32> to vector<2x16x4xf32>
    %37 = arith.truncf %36 : vector<2x16x4xf32> to vector<2x16x4xbf16>
    %38 = vector.extract_strided_slice %34 {offsets = [0, 0, 32], sizes = [2, 16, 4], strides = [1, 1, 1]} : vector<2x16x96xf32> to vector<2x16x4xf32>
    %39 = arith.truncf %38 : vector<2x16x4xf32> to vector<2x16x4xbf16>
    %40 = vector.extract_strided_slice %34 {offsets = [0, 0, 64], sizes = [2, 16, 4], strides = [1, 1, 1]} : vector<2x16x96xf32> to vector<2x16x4xf32>
    %41 = arith.truncf %40 : vector<2x16x4xf32> to vector<2x16x4xbf16>
    %cst_17 = arith.constant dense<0.000000e+00> : vector<2x16x16xf32>
    %42 = tpu.matmul %37, %39, %cst_17 {dimension_numbers = #tpu.dot_dimension_numbers<[2], [2], [1], [1], [0, 0, 0, 1, 1, 1], [0], [0]>} : vector<2x16x4xbf16>, vector<2x16x4xbf16>, vector<2x16x16xf32> -> vector<2x16x16xf32>
    %cst_18 = arith.constant 5.000000e-01 : f32
    %43 = vector.broadcast %cst_18 : f32 to vector<2x16x16xf32>
    %44 = arith.mulf %42, %43 : vector<2x16x16xf32>
    %cst_19 = arith.constant dense<0xFF800000> : vector<2x16xf32>
    %45 = vector.multi_reduction <maximumf>, %44, %cst_19 [2] : vector<2x16x16xf32> to vector<2x16xf32>
    %46 = vector.shape_cast %45 : vector<2x16xf32> to vector<2x16x1xf32>
    %47 = vector.broadcast %46 : vector<2x16x1xf32> to vector<2x16x16xf32>
    %48 = arith.subf %44, %47 : vector<2x16x16xf32>
    %49 = math.exp %48 : vector<2x16x16xf32>
    %cst_20 = arith.constant dense<0.000000e+00> : vector<2x16xf32>
    %50 = vector.multi_reduction <add>, %49, %cst_20 [2] : vector<2x16x16xf32> to vector<2x16xf32>
    %51 = vector.shape_cast %50 : vector<2x16xf32> to vector<2x16x1xf32>
    %52 = tpu.reciprocal %51 {approx = true} : vector<2x16x1xf32> -> vector<2x16x1xf32>
    %53 = vector.broadcast %52 : vector<2x16x1xf32> to vector<2x16x16xf32>
    %54 = arith.mulf %49, %53 : vector<2x16x16xf32>
    %55 = arith.truncf %54 : vector<2x16x16xf32> to vector<2x16x16xbf16>
    %cst_21 = arith.constant dense<0.000000e+00> : vector<2x16x4xf32>
    %56 = tpu.matmul %55, %41, %cst_21 {dimension_numbers = #tpu.dot_dimension_numbers<[2], [1], [1], [2], [0, 0, 0, 1, 1, 2], [0], [0]>} : vector<2x16x16xbf16>, vector<2x16x4xbf16>, vector<2x16x4xf32> -> vector<2x16x4xf32>
    %57 = vector.shape_cast %56 : vector<2x16x4xf32> to vector<32x4xf32>
    %58 = arith.truncf %57 : vector<32x4xf32> to vector<32x4xbf16>
    %c0_22 = arith.constant 0 : index
    %c0_23 = arith.constant 0 : index
    %c0_24 = arith.constant 0 : index
    %c0_25 = arith.constant 0 : index
    %59 = vector.load %arg5[%c0_22, %c0_23, %c0_24, %c0_25] : memref<1x8x4x32xbf16, #tpu.memory_space<vmem>>, vector<1x1x4x32xbf16>
    %60 = vector.shape_cast %59 : vector<1x1x4x32xbf16> to vector<4x32xbf16>
    %cst_26 = arith.constant dense<0.000000e+00> : vector<32x32xf32>
    %61 = tpu.matmul %58, %60, %cst_26 {dimension_numbers = #tpu.dot_dimension_numbers<[1], [0], [0], [1], [0, 0, 1, 1], [], []>} : vector<32x4xbf16>, vector<4x32xbf16>, vector<32x32xf32> -> vector<32x32xf32>
    %62 = arith.addf %35, %61 : vector<32x32xf32>
    %63 = vector.extract_strided_slice %34 {offsets = [0, 0, 4], sizes = [2, 16, 4], strides = [1, 1, 1]} : vector<2x16x96xf32> to vector<2x16x4xf32>
    %64 = arith.truncf %63 : vector<2x16x4xf32> to vector<2x16x4xbf16>
    %65 = vector.extract_strided_slice %34 {offsets = [0, 0, 36], sizes = [2, 16, 4], strides = [1, 1, 1]} : vector<2x16x96xf32> to vector<2x16x4xf32>
    %66 = arith.truncf %65 : vector<2x16x4xf32> to vector<2x16x4xbf16>
    %67 = vector.extract_strided_slice %34 {offsets = [0, 0, 68], sizes = [2, 16, 4], strides = [1, 1, 1]} : vector<2x16x96xf32> to vector<2x16x4xf32>
    %68 = arith.truncf %67 : vector<2x16x4xf32> to vector<2x16x4xbf16>
    %cst_27 = arith.constant dense<0.000000e+00> : vector<2x16x16xf32>
    %69 = tpu.matmul %64, %66, %cst_27 {dimension_numbers = #tpu.dot_dimension_numbers<[2], [2], [1], [1], [0, 0, 0, 1, 1, 1], [0], [0]>} : vector<2x16x4xbf16>, vector<2x16x4xbf16>, vector<2x16x16xf32> -> vector<2x16x16xf32>
    %cst_28 = arith.constant 5.000000e-01 : f32
    %70 = vector.broadcast %cst_28 : f32 to vector<2x16x16xf32>
    %71 = arith.mulf %69, %70 : vector<2x16x16xf32>
    %cst_29 = arith.constant dense<0xFF800000> : vector<2x16xf32>
    %72 = vector.multi_reduction <maximumf>, %71, %cst_29 [2] : vector<2x16x16xf32> to vector<2x16xf32>
    %73 = vector.shape_cast %72 : vector<2x16xf32> to vector<2x16x1xf32>
    %74 = vector.broadcast %73 : vector<2x16x1xf32> to vector<2x16x16xf32>
    %75 = arith.subf %71, %74 : vector<2x16x16xf32>
    %76 = math.exp %75 : vector<2x16x16xf32>
    %cst_30 = arith.constant dense<0.000000e+00> : vector<2x16xf32>
    %77 = vector.multi_reduction <add>, %76, %cst_30 [2] : vector<2x16x16xf32> to vector<2x16xf32>
    %78 = vector.shape_cast %77 : vector<2x16xf32> to vector<2x16x1xf32>
    %79 = tpu.reciprocal %78 {approx = true} : vector<2x16x1xf32> -> vector<2x16x1xf32>
    %80 = vector.broadcast %79 : vector<2x16x1xf32> to vector<2x16x16xf32>
    %81 = arith.mulf %76, %80 : vector<2x16x16xf32>
    %82 = arith.truncf %81 : vector<2x16x16xf32> to vector<2x16x16xbf16>
    %cst_31 = arith.constant dense<0.000000e+00> : vector<2x16x4xf32>
    %83 = tpu.matmul %82, %68, %cst_31 {dimension_numbers = #tpu.dot_dimension_numbers<[2], [1], [1], [2], [0, 0, 0, 1, 1, 2], [0], [0]>} : vector<2x16x16xbf16>, vector<2x16x4xbf16>, vector<2x16x4xf32> -> vector<2x16x4xf32>
    %84 = vector.shape_cast %83 : vector<2x16x4xf32> to vector<32x4xf32>
    %85 = arith.truncf %84 : vector<32x4xf32> to vector<32x4xbf16>
    %c0_32 = arith.constant 0 : index
    %c1 = arith.constant 1 : index
    %c0_33 = arith.constant 0 : index
    %c0_34 = arith.constant 0 : index
    %86 = vector.load %arg5[%c0_32, %c1, %c0_33, %c0_34] : memref<1x8x4x32xbf16, #tpu.memory_space<vmem>>, vector<1x1x4x32xbf16>
    %87 = vector.shape_cast %86 : vector<1x1x4x32xbf16> to vector<4x32xbf16>
    %cst_35 = arith.constant dense<0.000000e+00> : vector<32x32xf32>
    %88 = tpu.matmul %85, %87, %cst_35 {dimension_numbers = #tpu.dot_dimension_numbers<[1], [0], [0], [1], [0, 0, 1, 1], [], []>} : vector<32x4xbf16>, vector<4x32xbf16>, vector<32x32xf32> -> vector<32x32xf32>
    %89 = arith.addf %62, %88 : vector<32x32xf32>
    %90 = vector.extract_strided_slice %34 {offsets = [0, 0, 8], sizes = [2, 16, 4], strides = [1, 1, 1]} : vector<2x16x96xf32> to vector<2x16x4xf32>
    %91 = arith.truncf %90 : vector<2x16x4xf32> to vector<2x16x4xbf16>
    %92 = vector.extract_strided_slice %34 {offsets = [0, 0, 40], sizes = [2, 16, 4], strides = [1, 1, 1]} : vector<2x16x96xf32> to vector<2x16x4xf32>
    %93 = arith.truncf %92 : vector<2x16x4xf32> to vector<2x16x4xbf16>
    %94 = vector.extract_strided_slice %34 {offsets = [0, 0, 72], sizes = [2, 16, 4], strides = [1, 1, 1]} : vector<2x16x96xf32> to vector<2x16x4xf32>
    %95 = arith.truncf %94 : vector<2x16x4xf32> to vector<2x16x4xbf16>
    %cst_36 = arith.constant dense<0.000000e+00> : vector<2x16x16xf32>
    %96 = tpu.matmul %91, %93, %cst_36 {dimension_numbers = #tpu.dot_dimension_numbers<[2], [2], [1], [1], [0, 0, 0, 1, 1, 1], [0], [0]>} : vector<2x16x4xbf16>, vector<2x16x4xbf16>, vector<2x16x16xf32> -> vector<2x16x16xf32>
    %cst_37 = arith.constant 5.000000e-01 : f32
    %97 = vector.broadcast %cst_37 : f32 to vector<2x16x16xf32>
    %98 = arith.mulf %96, %97 : vector<2x16x16xf32>
    %cst_38 = arith.constant dense<0xFF800000> : vector<2x16xf32>
    %99 = vector.multi_reduction <maximumf>, %98, %cst_38 [2] : vector<2x16x16xf32> to vector<2x16xf32>
    %100 = vector.shape_cast %99 : vector<2x16xf32> to vector<2x16x1xf32>
    %101 = vector.broadcast %100 : vector<2x16x1xf32> to vector<2x16x16xf32>
    %102 = arith.subf %98, %101 : vector<2x16x16xf32>
    %103 = math.exp %102 : vector<2x16x16xf32>
    %cst_39 = arith.constant dense<0.000000e+00> : vector<2x16xf32>
    %104 = vector.multi_reduction <add>, %103, %cst_39 [2] : vector<2x16x16xf32> to vector<2x16xf32>
    %105 = vector.shape_cast %104 : vector<2x16xf32> to vector<2x16x1xf32>
    %106 = tpu.reciprocal %105 {approx = true} : vector<2x16x1xf32> -> vector<2x16x1xf32>
    %107 = vector.broadcast %106 : vector<2x16x1xf32> to vector<2x16x16xf32>
    %108 = arith.mulf %103, %107 : vector<2x16x16xf32>
    %109 = arith.truncf %108 : vector<2x16x16xf32> to vector<2x16x16xbf16>
    %cst_40 = arith.constant dense<0.000000e+00> : vector<2x16x4xf32>
    %110 = tpu.matmul %109, %95, %cst_40 {dimension_numbers = #tpu.dot_dimension_numbers<[2], [1], [1], [2], [0, 0, 0, 1, 1, 2], [0], [0]>} : vector<2x16x16xbf16>, vector<2x16x4xbf16>, vector<2x16x4xf32> -> vector<2x16x4xf32>
    %111 = vector.shape_cast %110 : vector<2x16x4xf32> to vector<32x4xf32>
    %112 = arith.truncf %111 : vector<32x4xf32> to vector<32x4xbf16>
    %c0_41 = arith.constant 0 : index
    %c2 = arith.constant 2 : index
    %c0_42 = arith.constant 0 : index
    %c0_43 = arith.constant 0 : index
    %113 = vector.load %arg5[%c0_41, %c2, %c0_42, %c0_43] : memref<1x8x4x32xbf16, #tpu.memory_space<vmem>>, vector<1x1x4x32xbf16>
    %114 = vector.shape_cast %113 : vector<1x1x4x32xbf16> to vector<4x32xbf16>
    %cst_44 = arith.constant dense<0.000000e+00> : vector<32x32xf32>
    %115 = tpu.matmul %112, %114, %cst_44 {dimension_numbers = #tpu.dot_dimension_numbers<[1], [0], [0], [1], [0, 0, 1, 1], [], []>} : vector<32x4xbf16>, vector<4x32xbf16>, vector<32x32xf32> -> vector<32x32xf32>
    %116 = arith.addf %89, %115 : vector<32x32xf32>
    %117 = vector.extract_strided_slice %34 {offsets = [0, 0, 12], sizes = [2, 16, 4], strides = [1, 1, 1]} : vector<2x16x96xf32> to vector<2x16x4xf32>
    %118 = arith.truncf %117 : vector<2x16x4xf32> to vector<2x16x4xbf16>
    %119 = vector.extract_strided_slice %34 {offsets = [0, 0, 44], sizes = [2, 16, 4], strides = [1, 1, 1]} : vector<2x16x96xf32> to vector<2x16x4xf32>
    %120 = arith.truncf %119 : vector<2x16x4xf32> to vector<2x16x4xbf16>
    %121 = vector.extract_strided_slice %34 {offsets = [0, 0, 76], sizes = [2, 16, 4], strides = [1, 1, 1]} : vector<2x16x96xf32> to vector<2x16x4xf32>
    %122 = arith.truncf %121 : vector<2x16x4xf32> to vector<2x16x4xbf16>
    %cst_45 = arith.constant dense<0.000000e+00> : vector<2x16x16xf32>
    %123 = tpu.matmul %118, %120, %cst_45 {dimension_numbers = #tpu.dot_dimension_numbers<[2], [2], [1], [1], [0, 0, 0, 1, 1, 1], [0], [0]>} : vector<2x16x4xbf16>, vector<2x16x4xbf16>, vector<2x16x16xf32> -> vector<2x16x16xf32>
    %cst_46 = arith.constant 5.000000e-01 : f32
    %124 = vector.broadcast %cst_46 : f32 to vector<2x16x16xf32>
    %125 = arith.mulf %123, %124 : vector<2x16x16xf32>
    %cst_47 = arith.constant dense<0xFF800000> : vector<2x16xf32>
    %126 = vector.multi_reduction <maximumf>, %125, %cst_47 [2] : vector<2x16x16xf32> to vector<2x16xf32>
    %127 = vector.shape_cast %126 : vector<2x16xf32> to vector<2x16x1xf32>
    %128 = vector.broadcast %127 : vector<2x16x1xf32> to vector<2x16x16xf32>
    %129 = arith.subf %125, %128 : vector<2x16x16xf32>
    %130 = math.exp %129 : vector<2x16x16xf32>
    %cst_48 = arith.constant dense<0.000000e+00> : vector<2x16xf32>
    %131 = vector.multi_reduction <add>, %130, %cst_48 [2] : vector<2x16x16xf32> to vector<2x16xf32>
    %132 = vector.shape_cast %131 : vector<2x16xf32> to vector<2x16x1xf32>
    %133 = tpu.reciprocal %132 {approx = true} : vector<2x16x1xf32> -> vector<2x16x1xf32>
    %134 = vector.broadcast %133 : vector<2x16x1xf32> to vector<2x16x16xf32>
    %135 = arith.mulf %130, %134 : vector<2x16x16xf32>
    %136 = arith.truncf %135 : vector<2x16x16xf32> to vector<2x16x16xbf16>
    %cst_49 = arith.constant dense<0.000000e+00> : vector<2x16x4xf32>
    %137 = tpu.matmul %136, %122, %cst_49 {dimension_numbers = #tpu.dot_dimension_numbers<[2], [1], [1], [2], [0, 0, 0, 1, 1, 2], [0], [0]>} : vector<2x16x16xbf16>, vector<2x16x4xbf16>, vector<2x16x4xf32> -> vector<2x16x4xf32>
    %138 = vector.shape_cast %137 : vector<2x16x4xf32> to vector<32x4xf32>
    %139 = arith.truncf %138 : vector<32x4xf32> to vector<32x4xbf16>
    %c0_50 = arith.constant 0 : index
    %c3 = arith.constant 3 : index
    %c0_51 = arith.constant 0 : index
    %c0_52 = arith.constant 0 : index
    %140 = vector.load %arg5[%c0_50, %c3, %c0_51, %c0_52] : memref<1x8x4x32xbf16, #tpu.memory_space<vmem>>, vector<1x1x4x32xbf16>
    %141 = vector.shape_cast %140 : vector<1x1x4x32xbf16> to vector<4x32xbf16>
    %cst_53 = arith.constant dense<0.000000e+00> : vector<32x32xf32>
    %142 = tpu.matmul %139, %141, %cst_53 {dimension_numbers = #tpu.dot_dimension_numbers<[1], [0], [0], [1], [0, 0, 1, 1], [], []>} : vector<32x4xbf16>, vector<4x32xbf16>, vector<32x32xf32> -> vector<32x32xf32>
    %143 = arith.addf %116, %142 : vector<32x32xf32>
    %144 = vector.extract_strided_slice %34 {offsets = [0, 0, 16], sizes = [2, 16, 4], strides = [1, 1, 1]} : vector<2x16x96xf32> to vector<2x16x4xf32>
    %145 = arith.truncf %144 : vector<2x16x4xf32> to vector<2x16x4xbf16>
    %146 = vector.extract_strided_slice %34 {offsets = [0, 0, 48], sizes = [2, 16, 4], strides = [1, 1, 1]} : vector<2x16x96xf32> to vector<2x16x4xf32>
    %147 = arith.truncf %146 : vector<2x16x4xf32> to vector<2x16x4xbf16>
    %148 = vector.extract_strided_slice %34 {offsets = [0, 0, 80], sizes = [2, 16, 4], strides = [1, 1, 1]} : vector<2x16x96xf32> to vector<2x16x4xf32>
    %149 = arith.truncf %148 : vector<2x16x4xf32> to vector<2x16x4xbf16>
    %cst_54 = arith.constant dense<0.000000e+00> : vector<2x16x16xf32>
    %150 = tpu.matmul %145, %147, %cst_54 {dimension_numbers = #tpu.dot_dimension_numbers<[2], [2], [1], [1], [0, 0, 0, 1, 1, 1], [0], [0]>} : vector<2x16x4xbf16>, vector<2x16x4xbf16>, vector<2x16x16xf32> -> vector<2x16x16xf32>
    %cst_55 = arith.constant 5.000000e-01 : f32
    %151 = vector.broadcast %cst_55 : f32 to vector<2x16x16xf32>
    %152 = arith.mulf %150, %151 : vector<2x16x16xf32>
    %cst_56 = arith.constant dense<0xFF800000> : vector<2x16xf32>
    %153 = vector.multi_reduction <maximumf>, %152, %cst_56 [2] : vector<2x16x16xf32> to vector<2x16xf32>
    %154 = vector.shape_cast %153 : vector<2x16xf32> to vector<2x16x1xf32>
    %155 = vector.broadcast %154 : vector<2x16x1xf32> to vector<2x16x16xf32>
    %156 = arith.subf %152, %155 : vector<2x16x16xf32>
    %157 = math.exp %156 : vector<2x16x16xf32>
    %cst_57 = arith.constant dense<0.000000e+00> : vector<2x16xf32>
    %158 = vector.multi_reduction <add>, %157, %cst_57 [2] : vector<2x16x16xf32> to vector<2x16xf32>
    %159 = vector.shape_cast %158 : vector<2x16xf32> to vector<2x16x1xf32>
    %160 = tpu.reciprocal %159 {approx = true} : vector<2x16x1xf32> -> vector<2x16x1xf32>
    %161 = vector.broadcast %160 : vector<2x16x1xf32> to vector<2x16x16xf32>
    %162 = arith.mulf %157, %161 : vector<2x16x16xf32>
    %163 = arith.truncf %162 : vector<2x16x16xf32> to vector<2x16x16xbf16>
    %cst_58 = arith.constant dense<0.000000e+00> : vector<2x16x4xf32>
    %164 = tpu.matmul %163, %149, %cst_58 {dimension_numbers = #tpu.dot_dimension_numbers<[2], [1], [1], [2], [0, 0, 0, 1, 1, 2], [0], [0]>} : vector<2x16x16xbf16>, vector<2x16x4xbf16>, vector<2x16x4xf32> -> vector<2x16x4xf32>
    %165 = vector.shape_cast %164 : vector<2x16x4xf32> to vector<32x4xf32>
    %166 = arith.truncf %165 : vector<32x4xf32> to vector<32x4xbf16>
    %c0_59 = arith.constant 0 : index
    %c4 = arith.constant 4 : index
    %c0_60 = arith.constant 0 : index
    %c0_61 = arith.constant 0 : index
    %167 = vector.load %arg5[%c0_59, %c4, %c0_60, %c0_61] : memref<1x8x4x32xbf16, #tpu.memory_space<vmem>>, vector<1x1x4x32xbf16>
    %168 = vector.shape_cast %167 : vector<1x1x4x32xbf16> to vector<4x32xbf16>
    %cst_62 = arith.constant dense<0.000000e+00> : vector<32x32xf32>
    %169 = tpu.matmul %166, %168, %cst_62 {dimension_numbers = #tpu.dot_dimension_numbers<[1], [0], [0], [1], [0, 0, 1, 1], [], []>} : vector<32x4xbf16>, vector<4x32xbf16>, vector<32x32xf32> -> vector<32x32xf32>
    %170 = arith.addf %143, %169 : vector<32x32xf32>
    %171 = vector.extract_strided_slice %34 {offsets = [0, 0, 20], sizes = [2, 16, 4], strides = [1, 1, 1]} : vector<2x16x96xf32> to vector<2x16x4xf32>
    %172 = arith.truncf %171 : vector<2x16x4xf32> to vector<2x16x4xbf16>
    %173 = vector.extract_strided_slice %34 {offsets = [0, 0, 52], sizes = [2, 16, 4], strides = [1, 1, 1]} : vector<2x16x96xf32> to vector<2x16x4xf32>
    %174 = arith.truncf %173 : vector<2x16x4xf32> to vector<2x16x4xbf16>
    %175 = vector.extract_strided_slice %34 {offsets = [0, 0, 84], sizes = [2, 16, 4], strides = [1, 1, 1]} : vector<2x16x96xf32> to vector<2x16x4xf32>
    %176 = arith.truncf %175 : vector<2x16x4xf32> to vector<2x16x4xbf16>
    %cst_63 = arith.constant dense<0.000000e+00> : vector<2x16x16xf32>
    %177 = tpu.matmul %172, %174, %cst_63 {dimension_numbers = #tpu.dot_dimension_numbers<[2], [2], [1], [1], [0, 0, 0, 1, 1, 1], [0], [0]>} : vector<2x16x4xbf16>, vector<2x16x4xbf16>, vector<2x16x16xf32> -> vector<2x16x16xf32>
    %cst_64 = arith.constant 5.000000e-01 : f32
    %178 = vector.broadcast %cst_64 : f32 to vector<2x16x16xf32>
    %179 = arith.mulf %177, %178 : vector<2x16x16xf32>
    %cst_65 = arith.constant dense<0xFF800000> : vector<2x16xf32>
    %180 = vector.multi_reduction <maximumf>, %179, %cst_65 [2] : vector<2x16x16xf32> to vector<2x16xf32>
    %181 = vector.shape_cast %180 : vector<2x16xf32> to vector<2x16x1xf32>
    %182 = vector.broadcast %181 : vector<2x16x1xf32> to vector<2x16x16xf32>
    %183 = arith.subf %179, %182 : vector<2x16x16xf32>
    %184 = math.exp %183 : vector<2x16x16xf32>
    %cst_66 = arith.constant dense<0.000000e+00> : vector<2x16xf32>
    %185 = vector.multi_reduction <add>, %184, %cst_66 [2] : vector<2x16x16xf32> to vector<2x16xf32>
    %186 = vector.shape_cast %185 : vector<2x16xf32> to vector<2x16x1xf32>
    %187 = tpu.reciprocal %186 {approx = true} : vector<2x16x1xf32> -> vector<2x16x1xf32>
    %188 = vector.broadcast %187 : vector<2x16x1xf32> to vector<2x16x16xf32>
    %189 = arith.mulf %184, %188 : vector<2x16x16xf32>
    %190 = arith.truncf %189 : vector<2x16x16xf32> to vector<2x16x16xbf16>
    %cst_67 = arith.constant dense<0.000000e+00> : vector<2x16x4xf32>
    %191 = tpu.matmul %190, %176, %cst_67 {dimension_numbers = #tpu.dot_dimension_numbers<[2], [1], [1], [2], [0, 0, 0, 1, 1, 2], [0], [0]>} : vector<2x16x16xbf16>, vector<2x16x4xbf16>, vector<2x16x4xf32> -> vector<2x16x4xf32>
    %192 = vector.shape_cast %191 : vector<2x16x4xf32> to vector<32x4xf32>
    %193 = arith.truncf %192 : vector<32x4xf32> to vector<32x4xbf16>
    %c0_68 = arith.constant 0 : index
    %c5 = arith.constant 5 : index
    %c0_69 = arith.constant 0 : index
    %c0_70 = arith.constant 0 : index
    %194 = vector.load %arg5[%c0_68, %c5, %c0_69, %c0_70] : memref<1x8x4x32xbf16, #tpu.memory_space<vmem>>, vector<1x1x4x32xbf16>
    %195 = vector.shape_cast %194 : vector<1x1x4x32xbf16> to vector<4x32xbf16>
    %cst_71 = arith.constant dense<0.000000e+00> : vector<32x32xf32>
    %196 = tpu.matmul %193, %195, %cst_71 {dimension_numbers = #tpu.dot_dimension_numbers<[1], [0], [0], [1], [0, 0, 1, 1], [], []>} : vector<32x4xbf16>, vector<4x32xbf16>, vector<32x32xf32> -> vector<32x32xf32>
    %197 = arith.addf %170, %196 : vector<32x32xf32>
    %198 = vector.extract_strided_slice %34 {offsets = [0, 0, 24], sizes = [2, 16, 4], strides = [1, 1, 1]} : vector<2x16x96xf32> to vector<2x16x4xf32>
    %199 = arith.truncf %198 : vector<2x16x4xf32> to vector<2x16x4xbf16>
    %200 = vector.extract_strided_slice %34 {offsets = [0, 0, 56], sizes = [2, 16, 4], strides = [1, 1, 1]} : vector<2x16x96xf32> to vector<2x16x4xf32>
    %201 = arith.truncf %200 : vector<2x16x4xf32> to vector<2x16x4xbf16>
    %202 = vector.extract_strided_slice %34 {offsets = [0, 0, 88], sizes = [2, 16, 4], strides = [1, 1, 1]} : vector<2x16x96xf32> to vector<2x16x4xf32>
    %203 = arith.truncf %202 : vector<2x16x4xf32> to vector<2x16x4xbf16>
    %cst_72 = arith.constant dense<0.000000e+00> : vector<2x16x16xf32>
    %204 = tpu.matmul %199, %201, %cst_72 {dimension_numbers = #tpu.dot_dimension_numbers<[2], [2], [1], [1], [0, 0, 0, 1, 1, 1], [0], [0]>} : vector<2x16x4xbf16>, vector<2x16x4xbf16>, vector<2x16x16xf32> -> vector<2x16x16xf32>
    %cst_73 = arith.constant 5.000000e-01 : f32
    %205 = vector.broadcast %cst_73 : f32 to vector<2x16x16xf32>
    %206 = arith.mulf %204, %205 : vector<2x16x16xf32>
    %cst_74 = arith.constant dense<0xFF800000> : vector<2x16xf32>
    %207 = vector.multi_reduction <maximumf>, %206, %cst_74 [2] : vector<2x16x16xf32> to vector<2x16xf32>
    %208 = vector.shape_cast %207 : vector<2x16xf32> to vector<2x16x1xf32>
    %209 = vector.broadcast %208 : vector<2x16x1xf32> to vector<2x16x16xf32>
    %210 = arith.subf %206, %209 : vector<2x16x16xf32>
    %211 = math.exp %210 : vector<2x16x16xf32>
    %cst_75 = arith.constant dense<0.000000e+00> : vector<2x16xf32>
    %212 = vector.multi_reduction <add>, %211, %cst_75 [2] : vector<2x16x16xf32> to vector<2x16xf32>
    %213 = vector.shape_cast %212 : vector<2x16xf32> to vector<2x16x1xf32>
    %214 = tpu.reciprocal %213 {approx = true} : vector<2x16x1xf32> -> vector<2x16x1xf32>
    %215 = vector.broadcast %214 : vector<2x16x1xf32> to vector<2x16x16xf32>
    %216 = arith.mulf %211, %215 : vector<2x16x16xf32>
    %217 = arith.truncf %216 : vector<2x16x16xf32> to vector<2x16x16xbf16>
    %cst_76 = arith.constant dense<0.000000e+00> : vector<2x16x4xf32>
    %218 = tpu.matmul %217, %203, %cst_76 {dimension_numbers = #tpu.dot_dimension_numbers<[2], [1], [1], [2], [0, 0, 0, 1, 1, 2], [0], [0]>} : vector<2x16x16xbf16>, vector<2x16x4xbf16>, vector<2x16x4xf32> -> vector<2x16x4xf32>
    %219 = vector.shape_cast %218 : vector<2x16x4xf32> to vector<32x4xf32>
    %220 = arith.truncf %219 : vector<32x4xf32> to vector<32x4xbf16>
    %c0_77 = arith.constant 0 : index
    %c6 = arith.constant 6 : index
    %c0_78 = arith.constant 0 : index
    %c0_79 = arith.constant 0 : index
    %221 = vector.load %arg5[%c0_77, %c6, %c0_78, %c0_79] : memref<1x8x4x32xbf16, #tpu.memory_space<vmem>>, vector<1x1x4x32xbf16>
    %222 = vector.shape_cast %221 : vector<1x1x4x32xbf16> to vector<4x32xbf16>
    %cst_80 = arith.constant dense<0.000000e+00> : vector<32x32xf32>
    %223 = tpu.matmul %220, %222, %cst_80 {dimension_numbers = #tpu.dot_dimension_numbers<[1], [0], [0], [1], [0, 0, 1, 1], [], []>} : vector<32x4xbf16>, vector<4x32xbf16>, vector<32x32xf32> -> vector<32x32xf32>
    %224 = arith.addf %197, %223 : vector<32x32xf32>
    %225 = vector.extract_strided_slice %34 {offsets = [0, 0, 28], sizes = [2, 16, 4], strides = [1, 1, 1]} : vector<2x16x96xf32> to vector<2x16x4xf32>
    %226 = arith.truncf %225 : vector<2x16x4xf32> to vector<2x16x4xbf16>
    %227 = vector.extract_strided_slice %34 {offsets = [0, 0, 60], sizes = [2, 16, 4], strides = [1, 1, 1]} : vector<2x16x96xf32> to vector<2x16x4xf32>
    %228 = arith.truncf %227 : vector<2x16x4xf32> to vector<2x16x4xbf16>
    %229 = vector.extract_strided_slice %34 {offsets = [0, 0, 92], sizes = [2, 16, 4], strides = [1, 1, 1]} : vector<2x16x96xf32> to vector<2x16x4xf32>
    %230 = arith.truncf %229 : vector<2x16x4xf32> to vector<2x16x4xbf16>
    %cst_81 = arith.constant dense<0.000000e+00> : vector<2x16x16xf32>
    %231 = tpu.matmul %226, %228, %cst_81 {dimension_numbers = #tpu.dot_dimension_numbers<[2], [2], [1], [1], [0, 0, 0, 1, 1, 1], [0], [0]>} : vector<2x16x4xbf16>, vector<2x16x4xbf16>, vector<2x16x16xf32> -> vector<2x16x16xf32>
    %cst_82 = arith.constant 5.000000e-01 : f32
    %232 = vector.broadcast %cst_82 : f32 to vector<2x16x16xf32>
    %233 = arith.mulf %231, %232 : vector<2x16x16xf32>
    %cst_83 = arith.constant dense<0xFF800000> : vector<2x16xf32>
    %234 = vector.multi_reduction <maximumf>, %233, %cst_83 [2] : vector<2x16x16xf32> to vector<2x16xf32>
    %235 = vector.shape_cast %234 : vector<2x16xf32> to vector<2x16x1xf32>
    %236 = vector.broadcast %235 : vector<2x16x1xf32> to vector<2x16x16xf32>
    %237 = arith.subf %233, %236 : vector<2x16x16xf32>
    %238 = math.exp %237 : vector<2x16x16xf32>
    %cst_84 = arith.constant dense<0.000000e+00> : vector<2x16xf32>
    %239 = vector.multi_reduction <add>, %238, %cst_84 [2] : vector<2x16x16xf32> to vector<2x16xf32>
    %240 = vector.shape_cast %239 : vector<2x16xf32> to vector<2x16x1xf32>
    %241 = tpu.reciprocal %240 {approx = true} : vector<2x16x1xf32> -> vector<2x16x1xf32>
    %242 = vector.broadcast %241 : vector<2x16x1xf32> to vector<2x16x16xf32>
    %243 = arith.mulf %238, %242 : vector<2x16x16xf32>
    %244 = arith.truncf %243 : vector<2x16x16xf32> to vector<2x16x16xbf16>
    %cst_85 = arith.constant dense<0.000000e+00> : vector<2x16x4xf32>
    %245 = tpu.matmul %244, %230, %cst_85 {dimension_numbers = #tpu.dot_dimension_numbers<[2], [1], [1], [2], [0, 0, 0, 1, 1, 2], [0], [0]>} : vector<2x16x16xbf16>, vector<2x16x4xbf16>, vector<2x16x4xf32> -> vector<2x16x4xf32>
    %246 = vector.shape_cast %245 : vector<2x16x4xf32> to vector<32x4xf32>
    %247 = arith.truncf %246 : vector<32x4xf32> to vector<32x4xbf16>
    %c0_86 = arith.constant 0 : index
    %c7 = arith.constant 7 : index
    %c0_87 = arith.constant 0 : index
    %c0_88 = arith.constant 0 : index
    %248 = vector.load %arg5[%c0_86, %c7, %c0_87, %c0_88] : memref<1x8x4x32xbf16, #tpu.memory_space<vmem>>, vector<1x1x4x32xbf16>
    %249 = vector.shape_cast %248 : vector<1x1x4x32xbf16> to vector<4x32xbf16>
    %cst_89 = arith.constant dense<0.000000e+00> : vector<32x32xf32>
    %250 = tpu.matmul %247, %249, %cst_89 {dimension_numbers = #tpu.dot_dimension_numbers<[1], [0], [0], [1], [0, 0, 1, 1], [], []>} : vector<32x4xbf16>, vector<4x32xbf16>, vector<32x32xf32> -> vector<32x32xf32>
    %251 = arith.addf %224, %250 : vector<32x32xf32>
    %252 = arith.addf %3, %251 : vector<32x32xf32>
    %c0_90 = arith.constant 0 : index
    %c0_91 = arith.constant 0 : index
    %c0_92 = arith.constant 0 : index
    %253 = vector.load %arg6[%c0_90, %c0_91, %c0_92] : memref<1x1x32xf32, #tpu.memory_space<vmem>>, vector<1x1x32xf32>
    %254 = vector.shape_cast %253 : vector<1x1x32xf32> to vector<1x32xf32>
    %255 = vector.broadcast %254 : vector<1x32xf32> to vector<32x32xf32>
    %256 = arith.addf %252, %255 : vector<32x32xf32>
    %c0_93 = arith.constant 0 : index
    %c0_94 = arith.constant 0 : index
    %c0_95 = arith.constant 0 : index
    %257 = vector.load %arg7[%c0_93, %c0_94, %c0_95] : memref<1x1x32xf32, #tpu.memory_space<vmem>>, vector<1x1x32xf32>
    %258 = vector.shape_cast %257 : vector<1x1x32xf32> to vector<1x32xf32>
    %c0_96 = arith.constant 0 : index
    %c0_97 = arith.constant 0 : index
    %c0_98 = arith.constant 0 : index
    %259 = vector.load %arg8[%c0_96, %c0_97, %c0_98] : memref<1x1x32xf32, #tpu.memory_space<vmem>>, vector<1x1x32xf32>
    %260 = vector.shape_cast %259 : vector<1x1x32xf32> to vector<1x32xf32>
    %cst_99 = arith.constant dense<0.000000e+00> : vector<32xf32>
    %261 = vector.multi_reduction <add>, %256, %cst_99 [1] : vector<32x32xf32> to vector<32xf32>
    %262 = vector.shape_cast %261 : vector<32xf32> to vector<32x1xf32>
    %cst_100 = arith.constant 3.200000e+01 : f32
    %263 = vector.broadcast %cst_100 : f32 to vector<32x1xf32>
    %264 = arith.divf %262, %263 : vector<32x1xf32>
    %265 = vector.broadcast %264 : vector<32x1xf32> to vector<32x32xf32>
    %266 = arith.subf %256, %265 : vector<32x32xf32>
    %267 = arith.mulf %266, %266 : vector<32x32xf32>
    %cst_101 = arith.constant dense<0.000000e+00> : vector<32xf32>
    %268 = vector.multi_reduction <add>, %267, %cst_101 [1] : vector<32x32xf32> to vector<32xf32>
    %269 = vector.shape_cast %268 : vector<32xf32> to vector<32x1xf32>
    %cst_102 = arith.constant 3.200000e+01 : f32
    %270 = vector.broadcast %cst_102 : f32 to vector<32x1xf32>
    %271 = arith.divf %269, %270 : vector<32x1xf32>
    %272 = vector.broadcast %264 : vector<32x1xf32> to vector<32x32xf32>
    %273 = arith.subf %256, %272 : vector<32x32xf32>
    %cst_103 = arith.constant 9.99999974E-6 : f32
    %274 = vector.broadcast %cst_103 : f32 to vector<32x1xf32>
    %275 = arith.addf %271, %274 : vector<32x1xf32>
    %276 = math.rsqrt %275 : vector<32x1xf32>
    %277 = vector.broadcast %276 : vector<32x1xf32> to vector<32x32xf32>
    %278 = arith.mulf %273, %277 : vector<32x32xf32>
    %279 = vector.broadcast %258 : vector<1x32xf32> to vector<32x32xf32>
    %280 = arith.mulf %278, %279 : vector<32x32xf32>
    %281 = vector.broadcast %260 : vector<1x32xf32> to vector<32x32xf32>
    %282 = arith.addf %280, %281 : vector<32x32xf32>
    %283 = arith.truncf %282 : vector<32x32xf32> to vector<32x32xbf16>
    %c0_104 = arith.constant 0 : index
    %c0_105 = arith.constant 0 : index
    %c0_106 = arith.constant 0 : index
    %284 = vector.load %arg9[%c0_104, %c0_105, %c0_106] : memref<1x32x64xbf16, #tpu.memory_space<vmem>>, vector<1x32x64xbf16>
    %285 = vector.shape_cast %284 : vector<1x32x64xbf16> to vector<32x64xbf16>
    %cst_107 = arith.constant dense<0.000000e+00> : vector<32x64xf32>
    %286 = tpu.matmul %283, %285, %cst_107 {dimension_numbers = #tpu.dot_dimension_numbers<[1], [0], [0], [1], [0, 0, 1, 1], [], []>} : vector<32x32xbf16>, vector<32x64xbf16>, vector<32x64xf32> -> vector<32x64xf32>
    %c0_108 = arith.constant 0 : index
    %c0_109 = arith.constant 0 : index
    %c0_110 = arith.constant 0 : index
    %287 = vector.load %arg10[%c0_108, %c0_109, %c0_110] : memref<1x1x64xf32, #tpu.memory_space<vmem>>, vector<1x1x64xf32>
    %288 = vector.shape_cast %287 : vector<1x1x64xf32> to vector<1x64xf32>
    %289 = vector.broadcast %288 : vector<1x64xf32> to vector<32x64xf32>
    %290 = arith.addf %286, %289 : vector<32x64xf32>
    %cst_111 = arith.constant 0.000000e+00 : f32
    %291 = vector.broadcast %cst_111 : f32 to vector<32x64xf32>
    %292 = arith.maximumf %290, %291 : vector<32x64xf32>
    %293 = arith.truncf %292 : vector<32x64xf32> to vector<32x64xbf16>
    %c0_112 = arith.constant 0 : index
    %c0_113 = arith.constant 0 : index
    %c0_114 = arith.constant 0 : index
    %294 = vector.load %arg11[%c0_112, %c0_113, %c0_114] : memref<1x64x32xbf16, #tpu.memory_space<vmem>>, vector<1x64x32xbf16>
    %295 = vector.shape_cast %294 : vector<1x64x32xbf16> to vector<64x32xbf16>
    %cst_115 = arith.constant dense<0.000000e+00> : vector<32x32xf32>
    %296 = tpu.matmul %293, %295, %cst_115 {dimension_numbers = #tpu.dot_dimension_numbers<[1], [0], [0], [1], [0, 0, 1, 1], [], []>} : vector<32x64xbf16>, vector<64x32xbf16>, vector<32x32xf32> -> vector<32x32xf32>
    %c0_116 = arith.constant 0 : index
    %c0_117 = arith.constant 0 : index
    %c0_118 = arith.constant 0 : index
    %297 = vector.load %arg12[%c0_116, %c0_117, %c0_118] : memref<1x1x32xf32, #tpu.memory_space<vmem>>, vector<1x1x32xf32>
    %298 = vector.shape_cast %297 : vector<1x1x32xf32> to vector<1x32xf32>
    %299 = vector.broadcast %298 : vector<1x32xf32> to vector<32x32xf32>
    %300 = arith.addf %296, %299 : vector<32x32xf32>
    %301 = arith.addf %256, %300 : vector<32x32xf32>
    %c0_119 = arith.constant 0 : index
    %c0_120 = arith.constant 0 : index
    %302 = vector.load %arg13[%c0_119, %c0_120] : memref<32x32xf32, #tpu.memory_space<vmem>>, vector<32x32xf32>
    tpu.vector_store %arg13[%c0_119, %c0_120], %301 {strides = array<i32>} : memref<32x32xf32, #tpu.memory_space<vmem>>, vector<32x32xf32>,
    return
  }
  func.func @transform_0(%arg0: i32) -> (i32, i32) {
    %c0_i32 = arith.constant 0 : i32
    %c0_i32_0 = arith.constant 0 : i32
    %c0_i32_1 = arith.constant 0 : i32
    return %c0_i32, %c0_i32_0 : i32, i32
  }
  func.func @transform_1(%arg0: i32) -> (i32, i32, i32) {
    %c0_i32 = arith.constant 0 : i32
    %c0_i32_0 = arith.constant 0 : i32
    %c0_i32_1 = arith.constant 0 : i32
    return %arg0, %c0_i32, %c0_i32_0 : i32, i32, i32
  }
  func.func @transform_2(%arg0: i32) -> (i32, i32, i32) {
    %c0_i32 = arith.constant 0 : i32
    %c0_i32_0 = arith.constant 0 : i32
    %c0_i32_1 = arith.constant 0 : i32
    return %arg0, %c0_i32, %c0_i32_0 : i32, i32, i32
  }
  func.func @transform_3(%arg0: i32) -> (i32, i32, i32) {
    %c0_i32 = arith.constant 0 : i32
    %c0_i32_0 = arith.constant 0 : i32
    %c0_i32_1 = arith.constant 0 : i32
    return %arg0, %c0_i32, %c0_i32_0 : i32, i32, i32
  }
  func.func @transform_4(%arg0: i32) -> (i32, i32, i32, i32) {
    %c0_i32 = arith.constant 0 : i32
    %c0_i32_0 = arith.constant 0 : i32
    %c0_i32_1 = arith.constant 0 : i32
    %c0_i32_2 = arith.constant 0 : i32
    return %arg0, %c0_i32, %c0_i32_0, %c0_i32_1 : i32, i32, i32, i32
  }
  func.func @transform_5(%arg0: i32) -> (i32, i32, i32) {
    %c0_i32 = arith.constant 0 : i32
    %c0_i32_0 = arith.constant 0 : i32
    %c0_i32_1 = arith.constant 0 : i32
    return %arg0, %c0_i32, %c0_i32_0 : i32, i32, i32
  }
  func.func @transform_6(%arg0: i32) -> (i32, i32, i32) {
    %c0_i32 = arith.constant 0 : i32
    %c0_i32_0 = arith.constant 0 : i32
    %c0_i32_1 = arith.constant 0 : i32
    return %arg0, %c0_i32, %c0_i32_0 : i32, i32, i32
  }
  func.func @transform_7(%arg0: i32) -> (i32, i32, i32) {
    %c0_i32 = arith.constant 0 : i32
    %c0_i32_0 = arith.constant 0 : i32
    %c0_i32_1 = arith.constant 0 : i32
    return %arg0, %c0_i32, %c0_i32_0 : i32, i32, i32
  }
  func.func @transform_8(%arg0: i32) -> (i32, i32, i32) {
    %c0_i32 = arith.constant 0 : i32
    %c0_i32_0 = arith.constant 0 : i32
    %c0_i32_1 = arith.constant 0 : i32
    return %arg0, %c0_i32, %c0_i32_0 : i32, i32, i32
  }
  func.func @transform_9(%arg0: i32) -> (i32, i32, i32) {
    %c0_i32 = arith.constant 0 : i32
    %c0_i32_0 = arith.constant 0 : i32
    %c0_i32_1 = arith.constant 0 : i32
    return %arg0, %c0_i32, %c0_i32_0 : i32, i32, i32
  }
  func.func @transform_10(%arg0: i32) -> (i32, i32, i32) {
    %c0_i32 = arith.constant 0 : i32
    %c0_i32_0 = arith.constant 0 : i32
    %c0_i32_1 = arith.constant 0 : i32
    return %arg0, %c0_i32, %c0_i32_0 : i32, i32, i32
  }
  func.func @transform_11(%arg0: i32) -> (i32, i32, i32) {
    %c0_i32 = arith.constant 0 : i32
    %c0_i32_0 = arith.constant 0 : i32
    %c0_i32_1 = arith.constant 0 : i32
    return %arg0, %c0_i32, %c0_i32_0 : i32, i32, i32
  }
  func.func @transform_12(%arg0: i32) -> (i32, i32) {
    %c0_i32 = arith.constant 0 : i32
    %c0_i32_0 = arith.constant 0 : i32
    %c0_i32_1 = arith.constant 0 : i32
    return %c0_i32, %c0_i32_0 : i32, i32
  }
}

</mosaic_0001>

<bundles_post_ra>
// kernel: altogether_forward.1
= control target key start
LH: loop header
LB: loop body
LE: loop exit
PB: predicated region body
PF: predicated region fallthrough
CT: control target
= control target key end

     0   :  { %s4407_s21 = smov 0   ;;  %s4950_s0 = inlined_call_operand.vmem [shape: f32[32,32], index: 0, kind: input, shape index: {}, may-alias: {0,12}]   ;;  %s4951_s1 = inlined_call_operand.vmem [shape: f32[2,1,32], index: 1, kind: input, shape index: {}]   ;;  %s4952_s2 = inlined_call_operand.vmem [shape: f32[2,1,32], index: 2, kind: input, shape index: {}]   ;;  %s4953_s3 = inlined_call_operand.vmem [shape: bf16[2,32,96], index: 3, kind: input, shape index: {}]   ;;  %s4954_s4 = inlined_call_operand.vmem [shape: bf16[2,8,4,32], index: 4, kind: input, shape index: {}]   ;;  %s4955_s5 = inlined_call_operand.vmem [shape: f32[2,1,32], index: 5, kind: input, shape index: {}]   ;;  %s4956_s6 = inlined_call_operand.vmem [shape: f32[2,1,32], index: 6, kind: input, shape index: {}]   ;;  %s4957_s7 = inlined_call_operand.vmem [shape: f32[2,1,32], index: 7, kind: input, shape index: {}]   ;;  %s4958_s8 = inlined_call_operand.vmem [shape: bf16[2,32,64], index: 8, kind: input, shape index: {}]   ;;  %s4959_s9 = inlined_call_operand.vmem [shape: f32[2,1,64], index: 9, kind: input, shape index: {}]   ;;  %s4960_s10 = inlined_call_operand.vmem [shape: bf16[2,64,32], index: 10, kind: input, shape index: {}]   ;;  %s4961_s11 = inlined_call_operand.vmem [shape: f32[2,1,32], index: 11, kind: input, shape index: {}]   ;;  %s4962_s12 = inlined_call_operand.vmem [shape: f32[32,32], index: 12, kind: output, shape index: {}, may-alias: {0,12}]  }
   0x1   :  { %4964 = sst [smem:[#allocation3_spill]] %s4953_s3 }
   0x2   :  { %4965 = sst [smem:[#allocation4_spill]] %s4954_s4 }
   0x3   :  { %4966 = sst [smem:[#allocation5_spill]] %s4955_s5 }
   0x4 LB: > { %4967 = sst [smem:[#allocation2_spill]] %s4315_s21  ;;  %s3619_s22 = sadd.s32 4294967295, %s4315_s21   ;;  %s4315_s21 = sphi %s4407_s21, %s22_s21  }
   0x5   : > { %p3622_p0 = scmp.ge.s32.totalorder %s4315_s21, 1  ;;  %p443_p1 = scmp.lt.s32.totalorder %s4315_s21, 3 }
   0x7   : > { %p444_p2 = pnand %p3622_p0, %p443_p1 }
   0x8   : > { %p516_p3 = scmp.lt.s32.totalorder (!%p444_p2), %s3619_s22, 1  ;;  %s4969_s3 = sld [smem:[#allocation3_spill]] (!%p444_p2) }
   0x9   : > { %447 = sbr.rel (%p444_p2) target bundleno = 6497 (0x1961), region = 68  ;;  %s4970_s4 = sld [smem:[#allocation4_spill]] (!%p444_p2) }
   0xa   : > { %p3631_p4 = scmp.ne.s32.totalorder (!%p444_p2), %s3619_s22, 0 }
  0x10   : > { %s4415_s23 = scalar_select %p516_p3, %s3619_s22, 1 }
  0x11   : > { %561 = sbr.rel (%p3631_p4) target bundleno = 28 (0x1c), region = 72  ;;  %v562_v0 = vld [vmem:[%s4950_s0] sm:$0xff] (!%p3631_p4)  ;;  %vm566_vm0 = vcmask (!%p3631_p4), 261120   ;;  %v563_v1 = vld [vmem:[%s4950_s0 + $0x8] sm:$0xff] (!%p3631_p4)  ;;  %v564_v2 = vld [vmem:[%s4950_s0 + $0x10] sm:$0xff] (!%p3631_p4) }
  0x12   : > { %s3710_s30 = sshll.u32 %s4415_s23, 4  ;;  %s540_s21 = scalar_lea.vmem %s4957_s7, %s4415_s23  ;;  %567 = vst.msk [vmem:[%s4962_s12] sm:$0xff] (!%p3631_p4), %vm566_vm0, %v562_v0  ;;  %568 = vst.msk [vmem:[%s4962_s12 + $0x8] sm:$0xff] (!%p3631_p4), %vm566_vm0, %v563_v1 }
  0x13   : > { %s4433_s18 = scalar_lea.vmem %s4969_s3, %s3710_s30  ;;  %s4438_s24 = scalar_lea.vmem %s4970_s4, %s3710_s30  ;;  %569 = vst.msk [vmem:[%s4962_s12 + $0x10] sm:$0xff] (!%p3631_p4), %vm566_vm0, %v564_v2 }
  0x14   : > { %s4451_s15 = scalar_lea.vmem %s4958_s8, %s3710_s30  ;;  %s548_s3 = scalar_lea.vmem %s4959_s9, %s4415_s23 }
  0x15   : > { %s3713_s19 = sshll.u32 %s4415_s23, 5  ;;  %s556_s5 = scalar_lea.vmem %s4961_s11, %s4415_s23 }
  0x16   : > { %s4465_s27 = scalar_lea.vmem %s4960_s10, %s3713_s19 }
  0x1a   : > { %v565_v3 = vld [vmem:[%s4950_s0 + $0x18] sm:$0xff] }
  0x1b   : > { %570 = vst.msk [vmem:[%s4962_s12 + $0x18] sm:$0xff] %vm566_vm0, %v565_v3 }
  0x1c PF: > { %vm577_vm1 = vcmask 261120   ;;  %v4153_v32 = vld [vmem:[%s4433_s18] sm:$0xff]   ;;  %v4154_v33 = vld [vmem:[%s4433_s18 + $0x8] sm:$0xff]   ;;  %s4971_s25 = scalar_lea.vmem %s4951_s1, %s4415_s23  ;;  %s4972_s30 = scalar_lea.vmem %s4952_s2, %s4415_s23  ;;  %v4317_v2 = vmov 0.0   ;;  %vm4318_vm2 = vmmov 0   ;;  %vm729_vm3 = vcmask 31744  }
  0x1d   : > { %v571_v4 = vld [vmem:[%s4962_s12] sm:$0xff]  ;;  %v572_v6 = vld [vmem:[%s4962_s12 + $0x8] sm:$0xff]  ;;  %3816 = vmatprep.subr.bf16.mxu1 %v4153_v32  ;;  %3830 = vmatprep.subr.bf16.mxu0 %v4317_v2  ;;  %s4319_s13 = smov 96   ;;  %vm831_vm4 = vcmask 130048   ;;  %s4320_s14 = smov 92   ;;  %vm1231_vm5 = vcmask 1041408  }
  0x1e   : > { %v573_v5 = vld [vmem:[%s4962_s12 + $0x10] sm:$0xff]  ;;  %v578_v7 = vsel %vm577_vm1, %v571_v4, 0.0  ;;  %v581_v10 = vsel %vm577_vm1, %v572_v6, 0.0  ;;  %3817 = vmatpush3.bf16.msra.mxu1 %v4153_v32  ;;  %v3632_v48 = vld [vmem:[%s4971_s25] ss:$0 sm:$0xff]  ;;  %3832 = vmatprep.mubr.msk.bf16.mxu0 %vm4318_vm2, %v4317_v2  ;;  %s4321_s16 = smov 64  }
  0x1f   : > { %v584_v8 = vsel %vm577_vm1, %v573_v5, 0.0  ;;  %579 = vadd.xlane.f32.xlu0 %v578_v7  ;;  %3818 = vmatprep.subr.bf16.mxu1 %v4154_v33  ;;  %v3633_v53 = vld [vmem:[%s4972_s30] ss:$0 sm:$0xff]  ;;  %s4322_s4 = smov 124   ;;  %s4323_s17 = smov 88   ;;  %vm3428_vm6 = vcmask 523264  }
  0x20   : > { %585 = vadd.xlane.f32.xlu1 %v584_v8  ;;  %s4324_s19 = smov 120   ;;  %s4325_s22 = smov 60  }
  0x21   : > { %s4326_s20 = smov 56   ;;  %s4327_s18 = smov 84  }
  0x22   : > { %v574_v9 = vld [vmem:[%s4962_s12 + $0x18] sm:$0xff]  ;;  %3819 = vmatpush3.bf16.msra.mxu1 %v4154_v33  ;;  %s4328_s26 = smov 116   ;;  %s4329_s25 = smov 52  }
  0x23   : > { %v587_v11 = vsel %vm577_vm1, %v574_v9, 0.0  ;;  %582 = vadd.xlane.f32.xlu0 %v581_v10  ;;  %3824 = vmatprep.subr.bf16.mxu1 %v4317_v2  ;;  %s4330_s29 = smov 112   ;;  %s4331_s28 = smov 80  }
  0x24   : > { %588 = vadd.xlane.f32.xlu1 %v587_v11  ;;  %s4332_s30 = smov 48  }
  0xac   : > { %v580_v12 = vpop.xlane.xlu0 %579 }
  0xad   : > { %v586_v13 = vpop.xlane.xlu1 %585  ;;  %v591_v14 = vmul.f32 0.03125, %v580_v12 }
  0xae   : > { %v593_v15 = vmul.f32 0.03125, %v586_v13 }
  0xaf   : > { %v595_v16 = vsub.f32 %v571_v4, %v591_v14 }
  0xb0   : > { %v597_v17 = vsub.f32 %v573_v5, %v593_v15  ;;  %v583_v18 = vpop.xlane.xlu0 %582 }
  0xb1   : > { %v589_v19 = vpop.xlane.xlu1 %588  ;;  %v592_v20 = vmul.f32 0.03125, %v583_v18  ;;  %v599_v22 = vmul.f32 %v595_v16, %v595_v16 }
  0xb2   : > { %v594_v21 = vmul.f32 0.03125, %v589_v19  ;;  %v601_v23 = vmul.f32 %v597_v17, %v597_v17 }
  0xb3   : > { %v596_v24 = vsub.f32 %v572_v6, %v592_v20  ;;  %v603_v26 = vsel %vm577_vm1, %v599_v22, 0.0 }
  0xb4   : > { %v598_v25 = vsub.f32 %v574_v9, %v594_v21  ;;  %604 = vadd.xlane.f32.xlu0 %v603_v26  ;;  %v609_v27 = vsel %vm577_vm1, %v601_v23, 0.0 }
  0xb5   : > { %v600_v28 = vmul.f32 %v596_v24, %v596_v24 }
  0xb6   : > { %v602_v29 = vmul.f32 %v598_v25, %v598_v25 }
  0xb7   : > { %v606_v30 = vsel %vm577_vm1, %v600_v28, 0.0 }
  0xb8   : > { %610 = vadd.xlane.f32.xlu0 %v609_v27  ;;  %607 = vadd.xlane.f32.xlu1 %v606_v30  ;;  %v612_v31 = vsel %vm577_vm1, %v602_v29, 0.0 }
  0xbc   : > { %613 = vadd.xlane.f32.xlu1 %v612_v31 }
 0x141   : > { %v605_v34 = vpop.xlane.xlu0 %604 }
 0x142   : > { %v615_v35 = vmul.f32 0.03125, %v605_v34 }
 0x144   : > { %v619_v36 = vadd.f32 1e-05, %v615_v35 }
 0x145   : > { %v608_v37 = vpop.xlane.xlu1 %607  ;;  %v611_v38 = vpop.xlane.xlu0 %610 }
 0x146   : > { %4161 = vrsqrt.f32 %v619_v36  ;;  %v616_v39 = vmul.f32 0.03125, %v608_v37  ;;  %v617_v40 = vmul.f32 0.03125, %v611_v38 }
 0x148   : > { %v620_v41 = vadd.f32 1e-05, %v616_v39  ;;  %v621_v42 = vadd.f32 1e-05, %v617_v40 }
 0x149   : > { %v614_v43 = vpop.xlane.xlu1 %613 }
 0x14a   : > { %4163 = vrsqrt.f32 %v620_v41  ;;  %v618_v44 = vmul.f32 0.03125, %v614_v43 }
 0x14b   : > { %4165 = vrsqrt.f32 %v621_v42 }
 0x14c   : > { %v622_v45 = vadd.f32 1e-05, %v618_v44 }
 0x14e   : > { %4167 = vrsqrt.f32 %v622_v45 }
 0x150   : > { %v4162_v46 = vpop.eup %4161 }
 0x151   : > { %v627_v47 = vmul.f32 %v4162_v46, %v595_v16 }
 0x153   : > { %v637_v52 = vmul.f32 %v3632_v48, %v627_v47 }
 0x154   : > { %v4164_v49 = vpop.eup %4163 }
 0x155   : > { %v4166_v50 = vpop.eup %4165  ;;  %v628_v51 = vmul.f32 %v4164_v49, %v596_v24  ;;  %v647_v57 = vadd.f32 %v3633_v53, %v637_v52 }
 0x156   : > { %v629_v54 = vmul.f32 %v4166_v50, %v597_v17 }
 0x157   : > { %v638_v55 = vmul.f32 %v3632_v48, %v628_v51 }
 0x158   : > { %v4168_v56 = vpop.eup %4167  ;;  %v639_v60 = vmul.f32 %v3632_v48, %v629_v54 }
 0x159   : > { %v648_v58 = vadd.f32 %v3633_v53, %v638_v55  ;;  %v630_v59 = vmul.f32 %v4168_v56, %v598_v25 }
 0x15a   : > { %v649_v63 = vadd.f32 %v3633_v53, %v639_v60 }
 0x15b   : > { %v651_v61 = vpack.c.bf16 %v648_v58, %v647_v57  ;;  %v640_v62 = vmul.f32 %v3632_v48, %v630_v59 }
 0x15d   : > { %3820 = vmatprep.mubr.msk.bf16.mxu1 %vm577_vm1, %v651_v61  ;;  %v650_v0 = vadd.f32 %v3633_v53, %v640_v62 }
 0x15f   : > { %v652_v1 = vpack.c.bf16 %v650_v0, %v649_v63 }
 0x161   : > { %3821 = vmatmul.mubr.msk.bf16.vlgmr.msra.gmra.mrb[0].mxu1 %vm577_vm1, %v652_v1 }
 0x162   : > { %3826 = vmatprep.mubr.msk.bf16.mxu1 %vm4318_vm2, %v4317_v2 }
 0x234   : > { %v3822_v3 = vpop.f32.mrb[0].mxu1 }
 0x235   : > { %v709_v4 = vpop.f32.mrb[1].mxu1 }
 0x236   : > { %v3823_v5 = vpop.f32.mrb[2].mxu1 }
 0x237   : > { %v4531_v6 = vpack.c.bf16 %v3823_v5, %v3822_v3  ;;  %v712_v7 = vpop.f32.mrb[3].mxu1 }
 0x238   : > { %v4533_v8 = vpack.c.bf16 %v712_v7, %v709_v4 }
 0x239   : > { %778 = vrot.lane.b32.xlu0 %v4531_v6, %s4319_s13 }
 0x23a   : > { %727 = vrot.lane.b32.xlu1 %v4533_v8, %s4319_s13  ;;  %s4333_s13 = smov 108  }
 0x2ab   : > { %v779_v9 = vpop.permute.xlu0 %778 }
 0x2ac   : > { %v728_v10 = vpop.permute.xlu1 %727  ;;  %v784_v11 = vsel %vm729_vm3, %v779_v9, 0 }
 0x2ad   : > { %v734_v12 = vsel %vm729_vm3, %v728_v10, 0  ;;  %3831 = vmatpush3.bf16.xpose.msra.mxu0 %v784_v11 }
 0x2ae   : > { %3825 = vmatpush3.bf16.xpose.msra.mxu1 %v734_v12  ;;  %3842 = vmatprep.subr.bf16.mxu0 %v4317_v2 }
 0x2af   : > { %3836 = vmatprep.subr.bf16.mxu1 %v4317_v2 }
 0x2b4   : > { %3833 = vmatmul.mubr.msk.bf16.vlgmr.msra.gmra.mrb[0].mxu0 %vm729_vm3, %v4531_v6 }
 0x2b5   : > { %3827 = vmatmul.mubr.msk.bf16.vlgmr.msra.gmra.mrb[4].mxu1 %vm729_vm3, %v4533_v8  ;;  %3844 = vmatprep.mubr.msk.bf16.mxu0 %vm4318_vm2, %v4317_v2 }
 0x2b6   : > { %3838 = vmatprep.mubr.msk.bf16.mxu1 %vm4318_vm2, %v4317_v2 }
 0x387   : > { %v820_v13 = vpop.f32.mrb[0].mxu0 }
 0x388   : > { %v829_v14 = vmul.f32 0.5, %v820_v13  ;;  %v770_v15 = vpop.f32.mrb[4].mxu1  ;;  %v3834_v16 = vpop.f32.mrb[1].mxu0 }
 0x389   : > { %v3828_v17 = vpop.f32.mrb[5].mxu1  ;;  %v823_v18 = vpop.f32.mrb[2].mxu0  ;;  %v827_v37 = vmul.f32 0.5, %v770_v15 }
 0x38a   : > { %v830_v19 = vmul.f32 0.5, %v823_v18  ;;  %v773_v20 = vpop.f32.mrb[6].mxu1  ;;  %v3835_v21 = vpop.f32.mrb[3].mxu0  ;;  %v838_v22 = vsel %vm831_vm4, %v829_v14, -inf }
 0x38b   : > { %839 = vmax.xlane.f32.xlu1 %v838_v22  ;;  %v3829_v23 = vpop.f32.mrb[7].mxu1  ;;  %v828_v35 = vmul.f32 0.5, %v773_v20  ;;  %v832_v38 = vsel %vm831_vm4, %v827_v37, -inf }
 0x38c   : > { %v841_v24 = vsel %vm831_vm4, %v830_v19, -inf }
 0x38d   : > { %842 = vmax.xlane.f32.xlu0 %v841_v24  ;;  %v835_v36 = vsel %vm831_vm4, %v828_v35, -inf }
 0x418   : > { %v840_v25 = vpop.xlane.xlu1 %839 }
 0x419   : > { %v846_v26 = vsub.f32 %v829_v14, %v840_v25 }
 0x41a   : > { %v843_v27 = vpop.xlane.xlu0 %842 }
 0x41b   : > { %v852_v28 = vmul.f32 1.442695, %v846_v26  ;;  %v847_v29 = vsub.f32 %v830_v19, %v843_v27 }
 0x41d   : > { %4169 = vpow2.f32 %v852_v28  ;;  %v854_v30 = vmul.f32 1.442695, %v847_v29 }
 0x41f   : > { %4171 = vpow2.f32 %v854_v30 }
 0x427   : > { %v4170_v31 = vpop.eup %4169 }
 0x428   : > { %v862_v32 = vsel %vm831_vm4, %v4170_v31, 0.0 }
 0x429   : > { %v4172_v33 = vpop.eup %4171  ;;  %863 = vadd.xlane.f32.xlu0 %v862_v32 }
 0x42a   : > { %v865_v34 = vsel %vm831_vm4, %v4172_v33, 0.0 }
 0x42b   : > { %866 = vadd.xlane.f32.xlu1 %v865_v34 }
 0x43c   : > { %1028 = vrot.lane.b32.xlu1 %v4531_v6, %s4320_s14 }
 0x43f   : > { %925 = vrot.lane.b32.xlu0 %v4531_v6, %s4321_s16 }
 0x440   : > { %1026 = vrot.lane.b32.xlu1 %v4531_v6, %s4322_s4 }
 0x45e   : > { %836 = vmax.xlane.f32.xlu0 %v835_v36 }
 0x464   : > { %833 = vmax.xlane.f32.xlu1 %v832_v38 }
 0x475   : > { %878 = vrot.lane.b32.xlu1 %v4533_v8, %s4321_s16  ;;  %s4335_s16 = smov 72  }
 0x479   : > { %975 = vrot.lane.b32.xlu1 %v4533_v8, %s4322_s4  ;;  %s4336_s4 = smov 44  }
 0x4b6   : > { %v864_v39 = vpop.xlane.xlu0 %863 }
 0x4b7   : > { %4173 = vrcp.f32 %v864_v39 }
 0x4b8   : > { %v867_v40 = vpop.xlane.xlu1 %866 }
 0x4b9   : > { %4175 = vrcp.f32 %v867_v40 }
 0x4ba   : > { %v926_v41 = vpop.permute.xlu0 %925 }
 0x4bb   : > { %3843 = vmatpush3.bf16.msra.mxu0 %v926_v41 }
 0x4bc   : > { %3854 = vmatprep.subr.bf16.mxu0 %v4317_v2  ;;  %v1029_v46 = vpop.permute.xlu1 %1028 }
 0x4bd   : > { %v1034_v48 = vsel %vm729_vm3, %v1029_v46, 0 }
 0x4c0   : > { %v1027_v49 = vpop.permute.xlu1 %1026 }
 0x4c1   : > { %v4174_v42 = vpop.eup %4173 }
 0x4c2   : > { %v874_v44 = vmul.f32 %v4174_v42, %v4170_v31 }
 0x4c3   : > { %v4176_v43 = vpop.eup %4175 }
 0x4c4   : > { %v875_v45 = vmul.f32 %v4176_v43, %v4172_v33 }
 0x4c6   : > { %v877_v47 = vpack.c.bf16 %v875_v45, %v874_v44 }
 0x4c8   : > { %3845 = vmatmul.mubr.msk.bf16.vlgmr.msra.gmra.mrb[4].mxu0 %vm831_vm4, %v877_v47 }
 0x4c9   : > { %3855 = vmatpush3.bf16.xpose.msra.mxu0 %v1034_v48  ;;  %3856 = vmatprep.mubr.msk.bf16.mxu0 %vm4318_vm2, %v4317_v2 }
 0x4ca   : > { %3866 = vmatprep.subr.bf16.mxu0 %v4317_v2 }
 0x4d0   : > { %3857 = vmatmul.mubr.msk.bf16.vlgmr.msra.gmra.mrb[8].mxu0 %vm729_vm3, %v1027_v49 }
 0x4d1   : > { %3868 = vmatprep.mubr.msk.bf16.mxu0 %vm4318_vm2, %v4317_v2 }
 0x4eb   : > { %v837_v50 = vpop.xlane.xlu0 %836 }
 0x4ec   : > { %v845_v51 = vsub.f32 %v828_v35, %v837_v50 }
 0x4ee   : > { %v850_v54 = vmul.f32 1.442695, %v845_v51 }
 0x4f1   : > { %v834_v52 = vpop.xlane.xlu1 %833 }
 0x4f2   : > { %v844_v53 = vsub.f32 %v827_v37, %v834_v52 }
 0x4f4   : > { %v848_v55 = vmul.f32 1.442695, %v844_v53 }
 0x4f5   : > { %v879_v56 = vpop.permute.xlu1 %878 }
 0x4f6   : > { %4177 = vpow2.f32 %v848_v55  ;;  %3837 = vmatpush3.bf16.msra.mxu1 %v879_v56 }
 0x4f7   : > { %3848 = vmatprep.subr.bf16.mxu1 %v4317_v2  ;;  %4179 = vpow2.f32 %v850_v54 }
 0x4f9   : > { %v976_v22 = vpop.permute.xlu1 %975 }
 0x500   : > { %v4178_v57 = vpop.eup %4177 }
 0x501   : > { %v856_v58 = vsel %vm831_vm4, %v4178_v57, 0.0  ;;  %v4180_v59 = vpop.eup %4179 }
 0x502   : > { %857 = vadd.xlane.f32.xlu0 %v856_v58  ;;  %v859_v60 = vsel %vm831_vm4, %v4180_v59, 0.0 }
 0x506   : > { %860 = vadd.xlane.f32.xlu0 %v859_v60 }
 0x51c   : > { %977 = vrot.lane.b32.xlu0 %v4533_v8, %s4320_s14  ;;  %s4334_s14 = smov 76  }
 0x58f   : > { %v858_v61 = vpop.xlane.xlu0 %857 }
 0x590   : > { %4181 = vrcp.f32 %v858_v61 }
 0x593   : > { %v861_v62 = vpop.xlane.xlu0 %860 }
 0x594   : > { %4183 = vrcp.f32 %v861_v62 }
 0x597   : > { %v978_v11 = vpop.permute.xlu0 %977 }
 0x598   : > { %v983_v13 = vsel %vm729_vm3, %v978_v11, 0 }
 0x59a   : > { %v4182_v0 = vpop.eup %4181 }
 0x59b   : > { %v4575_v63 = vpop.f32.mrb[4].mxu0  ;;  %v872_v9 = vmul.f32 %v4182_v0, %v4178_v57 }
 0x59c   : > { %v3846_v1 = vpop.f32.mrb[5].mxu0 }
 0x59d   : > { %v4577_v3 = vpop.f32.mrb[6].mxu0 }
 0x59e   : > { %v4184_v4 = vpop.eup %4183  ;;  %v973_v5 = vpack.c.bf16 %v4577_v3, %v4575_v63  ;;  %v3847_v7 = vpop.f32.mrb[7].mxu0 }
 0x59f   : > { %v873_v10 = vmul.f32 %v4184_v4, %v4180_v59 }
 0x5a1   : > { %v876_v12 = vpack.c.bf16 %v873_v10, %v872_v9 }
 0x5a3   : > { %3839 = vmatmul.mubr.msk.bf16.vlgmr.msra.gmra.mrb[8].mxu1 %vm831_vm4, %v876_v12  ;;  %v1070_v14 = vpop.f32.mrb[8].mxu0 }
 0x5a4   : > { %3849 = vmatpush3.bf16.xpose.msra.mxu1 %v983_v13  ;;  %v1079_v15 = vmul.f32 0.5, %v1070_v14  ;;  %v3858_v16 = vpop.f32.mrb[9].mxu0  ;;  %3850 = vmatprep.mubr.msk.bf16.mxu1 %vm4318_vm2, %v4317_v2 }
 0x5a5   : > { %v1073_v17 = vpop.f32.mrb[10].mxu0  ;;  %3860 = vmatprep.subr.bf16.mxu1 %v4317_v2 }
 0x5a6   : > { %v1080_v18 = vmul.f32 0.5, %v1073_v17  ;;  %v3859_v19 = vpop.f32.mrb[11].mxu0  ;;  %v1087_v20 = vsel %vm831_vm4, %v1079_v15, -inf }
 0x5a7   : > { %1088 = vmax.xlane.f32.xlu1 %v1087_v20 }
 0x5a8   : > { %v1090_v21 = vsel %vm831_vm4, %v1080_v18, -inf }
 0x5a9   : > { %1091 = vmax.xlane.f32.xlu0 %v1090_v21 }
 0x5ab   : > { %3851 = vmatmul.mubr.msk.bf16.vlgmr.msra.gmra.mrb[12].mxu1 %vm729_vm3, %v976_v22 }
 0x5ac   : > { %3862 = vmatprep.mubr.msk.bf16.mxu1 %vm4318_vm2, %v4317_v2 }
 0x5b8   : > { %1344 = vrot.lane.b32.xlu1 %v4533_v8, %s4323_s17 }
 0x634   : > { %v1089_v23 = vpop.xlane.xlu1 %1088 }
 0x635   : > { %v1095_v24 = vsub.f32 %v1079_v15, %v1089_v23 }
 0x636   : > { %v1092_v25 = vpop.xlane.xlu0 %1091 }
 0x637   : > { %v1101_v26 = vmul.f32 1.442695, %v1095_v24  ;;  %v1096_v27 = vsub.f32 %v1080_v18, %v1092_v25 }
 0x638   : > { %v1345_v46 = vpop.permute.xlu1 %1344 }
 0x639   : > { %4185 = vpow2.f32 %v1101_v26  ;;  %v1103_v28 = vmul.f32 1.442695, %v1096_v27  ;;  %v1350_v56 = vsel %vm729_vm3, %v1345_v46, 0  ;;  %v974_v46 = vld [vmem:[%s4438_s24] sm:$0x3] }
 0x63b   : > { %4187 = vpow2.f32 %v1103_v28 }
 0x643   : > { %v4186_v29 = vpop.eup %4185 }
 0x644   : > { %v1111_v30 = vsel %vm831_vm4, %v4186_v29, 0.0 }
 0x645   : > { %v4188_v31 = vpop.eup %4187  ;;  %1112 = vadd.xlane.f32.xlu0 %v1111_v30 }
 0x646   : > { %v1114_v32 = vsel %vm831_vm4, %v4188_v31, 0.0 }
 0x647   : > { %1115 = vadd.xlane.f32.xlu1 %v1114_v32 }
 0x658   : > { %1342 = vrot.lane.b32.xlu1 %v4533_v8, %s4324_s19 }
 0x65b   : > { %1174 = vrot.lane.b32.xlu0 %v4531_v6, %s4325_s22 }
 0x65c   : > { %1395 = vrot.lane.b32.xlu1 %v4531_v6, %s4323_s17  ;;  %s4337_s17 = smov 104  }
 0x65f   : > { %1393 = vrot.lane.b32.xlu0 %v4531_v6, %s4324_s19  ;;  %s4338_s19 = smov 40  }
 0x676   : > { %v4598_v33 = vpop.f32.mrb[8].mxu1 }
 0x677   : > { %v3840_v34 = vpop.f32.mrb[9].mxu1 }
 0x678   : > { %v4600_v35 = vpop.f32.mrb[10].mxu1 }
 0x679   : > { %v972_v36 = vpack.c.bf16 %v4600_v35, %v4598_v33  ;;  %v3841_v37 = vpop.f32.mrb[11].mxu1 }
 0x67e   : > { %v1019_v38 = vpop.f32.mrb[12].mxu1 }
 0x67f   : > { %v1077_v39 = vmul.f32 0.5, %v1019_v38  ;;  %v3852_v40 = vpop.f32.mrb[13].mxu1 }
 0x680   : > { %v1022_v41 = vpop.f32.mrb[14].mxu1 }
 0x681   : > { %v1078_v42 = vmul.f32 0.5, %v1022_v41  ;;  %v3853_v43 = vpop.f32.mrb[15].mxu1  ;;  %v1081_v44 = vsel %vm831_vm4, %v1077_v39, -inf }
 0x682   : > { %1082 = vmax.xlane.f32.xlu1 %v1081_v44  ;;  %v3646_v44 = vld [vmem:[%s4438_s24 + $0x2] sm:$0x3] }
 0x683   : > { %v1084_v45 = vsel %vm831_vm4, %v1078_v42, -inf }
 0x684   : > { %1085 = vmax.xlane.f32.xlu0 %v1084_v45  ;;  %v1233_v45 = vsel %vm1231_vm5, %v3646_v44, 0 }
 0x693   : > { %1127 = vrot.lane.b32.xlu1 %v4533_v8, %s4325_s22  ;;  %s4339_s22 = smov 68  }
 0x6d2   : > { %v1113_v47 = vpop.xlane.xlu0 %1112 }
 0x6d3   : > { %4189 = vrcp.f32 %v1113_v47 }
 0x6d4   : > { %v1116_v48 = vpop.xlane.xlu1 %1115 }
 0x6d5   : > { %4191 = vrcp.f32 %v1116_v48 }
 0x6d6   : > { %v1175_v49 = vpop.permute.xlu0 %1174 }
 0x6d7   : > { %3867 = vmatpush3.bf16.msra.mxu0 %v1175_v49 }
 0x6d8   : > { %3884 = vmatprep.subr.bf16.mxu0 %v4317_v2  ;;  %v1343_v55 = vpop.permute.xlu1 %1342 }
 0x6da   : > { %v1394_v59 = vpop.permute.xlu0 %1393 }
 0x6dc   : > { %v1396_v57 = vpop.permute.xlu1 %1395 }
 0x6dd   : > { %v4190_v50 = vpop.eup %4189  ;;  %v1401_v58 = vsel %vm729_vm3, %v1396_v57, 0 }
 0x6de   : > { %v1123_v52 = vmul.f32 %v4190_v50, %v4186_v29 }
 0x6df   : > { %v4192_v51 = vpop.eup %4191 }
 0x6e0   : > { %v1124_v53 = vmul.f32 %v4192_v51, %v4188_v31 }
 0x6e2   : > { %v1126_v54 = vpack.c.bf16 %v1124_v53, %v1123_v52 }
 0x6e4   : > { %3869 = vmatmul.mubr.msk.bf16.vlgmr.msra.gmra.mrb[12].mxu0 %vm831_vm4, %v1126_v54 }
 0x6e5   : > { %3885 = vmatpush3.bf16.xpose.msra.mxu0 %v1350_v56  ;;  %3886 = vmatprep.mubr.msk.bf16.mxu0 %vm4318_vm2, %v4317_v2 }
 0x6e6   : > { %3890 = vmatprep.subr.bf16.mxu0 %v4317_v2 }
 0x6ec   : > { %3887 = vmatmul.mubr.msk.bf16.vlgmr.msra.gmra.mrb[16].mxu0 %vm729_vm3, %v1343_v55 }
 0x6ed   : > { %3891 = vmatpush3.bf16.xpose.msra.mxu0 %v1401_v58  ;;  %3892 = vmatprep.mubr.msk.bf16.mxu0 %vm4318_vm2, %v4317_v2 }
 0x6ee   : > { %3902 = vmatprep.subr.bf16.mxu0 %v4317_v2 }
 0x6f4   : > { %3893 = vmatmul.mubr.msk.bf16.vlgmr.msra.gmra.mrb[20].mxu0 %vm729_vm3, %v1394_v59 }
 0x6f5   : > { %3904 = vmatprep.mubr.msk.bf16.mxu0 %vm4318_vm2, %v4317_v2 }
 0x70f   : > { %v1083_v60 = vpop.xlane.xlu1 %1082 }
 0x710   : > { %v1093_v61 = vsub.f32 %v1077_v39, %v1083_v60 }
 0x711   : > { %v1086_v62 = vpop.xlane.xlu0 %1085 }
 0x712   : > { %v1097_v0 = vmul.f32 1.442695, %v1093_v61  ;;  %v1094_v1 = vsub.f32 %v1078_v42, %v1086_v62 }
 0x713   : > { %v1128_v4 = vpop.permute.xlu1 %1127 }
 0x714   : > { %4193 = vpow2.f32 %v1097_v0  ;;  %v1099_v7 = vmul.f32 1.442695, %v1094_v1  ;;  %3861 = vmatpush3.bf16.msra.mxu1 %v1128_v4 }
 0x715   : > { %4112 = vmatprep.subr.msk.bf16.mxu1 %vm1231_vm5, %v3646_v44 }
 0x716   : > { %4195 = vpow2.f32 %v1099_v7 }
 0x71e   : > { %v4194_v9 = vpop.eup %4193 }
 0x71f   : > { %v1105_v10 = vsel %vm831_vm4, %v4194_v9, 0.0 }
 0x720   : > { %v4196_v11 = vpop.eup %4195  ;;  %1106 = vadd.xlane.f32.xlu0 %v1105_v10 }
 0x721   : > { %v1108_v12 = vsel %vm831_vm4, %v4196_v11, 0.0 }
 0x724   : > { %1109 = vadd.xlane.f32.xlu0 %v1108_v12 }
 0x7ad   : > { %v1107_v13 = vpop.xlane.xlu0 %1106 }
 0x7ae   : > { %4197 = vrcp.f32 %v1107_v13 }
 0x7b1   : > { %v1110_v14 = vpop.xlane.xlu0 %1109 }
 0x7b2   : > { %4199 = vrcp.f32 %v1110_v14  ;;  %v1291_v14 = vsel %vm1231_vm5, %v974_v46, 0 }
 0x7b7   : > { %v4623_v15 = vpop.f32.mrb[12].mxu0 }
 0x7b8   : > { %v3870_v16 = vpop.f32.mrb[13].mxu0  ;;  %v4198_v18 = vpop.eup %4197 }
 0x7b9   : > { %v4625_v17 = vpop.f32.mrb[14].mxu0  ;;  %v1121_v22 = vmul.f32 %v4198_v18, %v4194_v9 }
 0x7ba   : > { %v1222_v19 = vpack.c.bf16 %v4625_v17, %v4623_v15  ;;  %v3871_v20 = vpop.f32.mrb[15].mxu0 }
 0x7bc   : > { %v4200_v21 = vpop.eup %4199 }
 0x7bd   : > { %v1122_v23 = vmul.f32 %v4200_v21, %v4196_v11 }
 0x7bf   : > { %v1386_v24 = vpop.f32.mrb[16].mxu0  ;;  %v1125_v25 = vpack.c.bf16 %v1122_v23, %v1121_v22 }
 0x7c0   : > { %v1444_v26 = vmul.f32 0.5, %v1386_v24  ;;  %v3888_v27 = vpop.f32.mrb[17].mxu0 }
 0x7c1   : > { %3863 = vmatmul.mubr.msk.bf16.vlgmr.msra.gmra.mrb[16].mxu1 %vm831_vm4, %v1125_v25  ;;  %v1389_v28 = vpop.f32.mrb[18].mxu0 }
 0x7c2   : > { %v1445_v29 = vmul.f32 0.5, %v1389_v28  ;;  %v3889_v30 = vpop.f32.mrb[19].mxu0  ;;  %v1448_v31 = vsel %vm831_vm4, %v1444_v26, -inf  ;;  %3873 = vmatpush3.bf16.msra.mxu1 %v1233_v45  ;;  %v3655_v28 = vld [vmem:[%s4438_s24 + $0x4] sm:$0x3] }
 0x7c3   : > { %1449 = vmax.xlane.f32.xlu0 %v1448_v31  ;;  %4113 = vmatprep.subr.msk.bf16.mxu1 %vm1231_vm5, %v974_v46 }
 0x7c4   : > { %v1451_v32 = vsel %vm831_vm4, %v1445_v29, -inf }
 0x7c7   : > { %v1437_v34 = vpop.f32.mrb[20].mxu0  ;;  %1452 = vmax.xlane.f32.xlu0 %v1451_v32 }
 0x7c8   : > { %v1446_v37 = vmul.f32 0.5, %v1437_v34  ;;  %v3894_v38 = vpop.f32.mrb[21].mxu0 }
 0x7c9   : > { %v1440_v39 = vpop.f32.mrb[22].mxu0 }
 0x7ca   : > { %v1447_v40 = vmul.f32 0.5, %v1440_v39  ;;  %v3895_v41 = vpop.f32.mrb[23].mxu0  ;;  %v1454_v42 = vsel %vm831_vm4, %v1446_v37, -inf }
 0x7cb   : > { %1455 = vmax.xlane.f32.xlu0 %v1454_v42 }
 0x7cc   : > { %v1457_v43 = vsel %vm831_vm4, %v1447_v40, -inf }
 0x7cf   : > { %1458 = vmax.xlane.f32.xlu0 %v1457_v43 }
 0x850   : > { %v1450_v47 = vpop.xlane.xlu0 %1449 }
 0x851   : > { %v1460_v48 = vsub.f32 %v1444_v26, %v1450_v47 }
 0x853   : > { %v1464_v49 = vmul.f32 1.442695, %v1460_v48 }
 0x854   : > { %v1453_v50 = vpop.xlane.xlu0 %1452 }
 0x855   : > { %4201 = vpow2.f32 %v1464_v49  ;;  %v1461_v51 = vsub.f32 %v1445_v29, %v1453_v50  ;;  %v1599_v29 = vsel %vm1231_vm5, %v3655_v28, 0 }
 0x857   : > { %v1466_v52 = vmul.f32 1.442695, %v1461_v51 }
 0x858   : > { %v1456_v53 = vpop.xlane.xlu0 %1455 }
 0x859   : > { %4203 = vpow2.f32 %v1466_v52  ;;  %v1462_v54 = vsub.f32 %v1446_v37, %v1456_v53 }
 0x85b   : > { %v1468_v55 = vmul.f32 1.442695, %v1462_v54 }
 0x85c   : > { %v1459_v56 = vpop.xlane.xlu0 %1458 }
 0x85d   : > { %4205 = vpow2.f32 %v1468_v55  ;;  %v1463_v57 = vsub.f32 %v1447_v40, %v1459_v56 }
 0x85f   : > { %v4202_v58 = vpop.eup %4201  ;;  %v1470_v59 = vmul.f32 1.442695, %v1463_v57 }
 0x860   : > { %v1472_v60 = vsel %vm831_vm4, %v4202_v58, 0.0 }
 0x861   : > { %4207 = vpow2.f32 %v1470_v59  ;;  %1473 = vadd.xlane.f32.xlu1 %v1472_v60 }
 0x863   : > { %v4204_v61 = vpop.eup %4203 }
 0x864   : > { %v1475_v62 = vsel %vm831_vm4, %v4204_v61, 0.0 }
 0x865   : > { %1476 = vadd.xlane.f32.xlu0 %v1475_v62 }
 0x867   : > { %v4206_v0 = vpop.eup %4205 }
 0x868   : > { %v1478_v1 = vsel %vm831_vm4, %v4206_v0, 0.0 }
 0x869   : > { %1479 = vadd.xlane.f32.xlu0 %v1478_v1 }
 0x86b   : > { %v4208_v4 = vpop.eup %4207 }
 0x86c   : > { %v1481_v7 = vsel %vm831_vm4, %v4208_v4, 0.0 }
 0x86d   : > { %1482 = vadd.xlane.f32.xlu0 %v1481_v7 }
 0x872   : > { %1541 = vrot.lane.b32.xlu1 %v4531_v6, %s4326_s20 }
 0x883   : > { %1494 = vrot.lane.b32.xlu0 %v4533_v8, %s4326_s20  ;;  %s4340_s20 = smov 100  }
 0x887   : > { %1656 = vrot.lane.b32.xlu0 %v4533_v8, %s4327_s18 }
 0x88b   : > { %1654 = vrot.lane.b32.xlu0 %v4533_v8, %s4328_s26 }
 0x88f   : > { %1707 = vrot.lane.b32.xlu0 %v4531_v6, %s4327_s18  ;;  %s4341_s18 = smov 36  }
 0x893   : > { %1705 = vrot.lane.b32.xlu0 %v4531_v6, %s4328_s26 }
 0x894   : > { %v1167_v9 = vpop.f32.mrb[16].mxu1 }
 0x895   : > { %v3864_v10 = vpop.f32.mrb[17].mxu1 }
 0x896   : > { %v1170_v11 = vpop.f32.mrb[18].mxu1 }
 0x897   : > { %v1221_v12 = vpack.c.bf16 %v1170_v11, %v1167_v9  ;;  %v3865_v13 = vpop.f32.mrb[19].mxu1 }
 0x899   : > { %3874 = vmatprep.mubr.msk.bf16.mxu1 %vm729_vm3, %v1221_v12 }
 0x89a   : > { %3875 = vmatmul.mubr.msk.bf16.vlgmr.msra.gmra.mrb[20].mxu1 %vm729_vm3, %v1222_v19 }
 0x89b   : > { %3880 = vmatprep.mubr.msk.bf16.mxu1 %vm729_vm3, %v972_v36  ;;  %3879 = vmatpush3.bf16.msra.mxu1 %v1291_v14 }
 0x89c   : > { %3896 = vmatprep.subr.bf16.mxu1 %v4317_v2 }
 0x8a6   : > { %3881 = vmatmul.mubr.msk.bf16.vlgmr.msra.gmra.mrb[20].mxu1 %vm729_vm3, %v973_v5 }
 0x8a7   : > { %3898 = vmatprep.mubr.msk.bf16.mxu1 %vm4318_vm2, %v4317_v2 }
 0x8ee   : > { %v1474_v16 = vpop.xlane.xlu1 %1473 }
 0x8ef   : > { %4209 = vrcp.f32 %v1474_v16 }
 0x8f2   : > { %v1477_v15 = vpop.xlane.xlu0 %1476  ;;  %v1542_v17 = vpop.permute.xlu1 %1541 }
 0x8f3   : > { %4211 = vrcp.f32 %v1477_v15  ;;  %3903 = vmatpush3.bf16.msra.mxu0 %v1542_v17 }
 0x8f4   : > { %3914 = vmatprep.subr.bf16.mxu0 %v4317_v2 }
 0x8f6   : > { %v1480_v33 = vpop.xlane.xlu0 %1479 }
 0x8f7   : > { %4213 = vrcp.f32 %v1480_v33 }
 0x8f9   : > { %v4210_v36 = vpop.eup %4209 }
 0x8fa   : > { %v1483_v35 = vpop.xlane.xlu0 %1482  ;;  %v1488_v63 = vmul.f32 %v4210_v36, %v4202_v58 }
 0x8fb   : > { %4215 = vrcp.f32 %v1483_v35 }
 0x8fd   : > { %v4212_v18 = vpop.eup %4211 }
 0x8fe   : > { %v1489_v3 = vmul.f32 %v4212_v18, %v4204_v61  ;;  %v1495_v5 = vpop.permute.xlu0 %1494 }
 0x8ff   : > { %3897 = vmatpush3.bf16.msra.mxu1 %v1495_v5 }
 0x900   : > { %v1492_v19 = vpack.c.bf16 %v1489_v3, %v1488_v63  ;;  %4114 = vmatprep.subr.msk.bf16.mxu1 %vm1231_vm5, %v3655_v28 }
 0x901   : > { %v4214_v20 = vpop.eup %4213 }
 0x902   : > { %3899 = vmatmul.mubr.msk.bf16.vlgmr.msra.gmra.mrb[24].mxu1 %vm831_vm4, %v1492_v19  ;;  %v1490_v22 = vmul.f32 %v4214_v20, %v4206_v0  ;;  %v1657_v24 = vpop.permute.xlu0 %1656 }
 0x903   : > { %v1662_v26 = vsel %vm729_vm3, %v1657_v24, 0  ;;  %3909 = vmatpush3.bf16.msra.mxu1 %v1599_v29 }
 0x904   : > { %3920 = vmatprep.subr.bf16.mxu1 %v4317_v2 }
 0x905   : > { %v4216_v21 = vpop.eup %4215 }
 0x906   : > { %v1491_v23 = vmul.f32 %v4216_v21, %v4208_v4  ;;  %v1655_v27 = vpop.permute.xlu0 %1654 }
 0x908   : > { %v1493_v25 = vpack.c.bf16 %v1491_v23, %v1490_v22 }
 0x90a   : > { %3905 = vmatmul.mubr.msk.bf16.vlgmr.msra.gmra.mrb[24].mxu0 %vm831_vm4, %v1493_v25  ;;  %v1708_v40 = vpop.permute.xlu0 %1707 }
 0x90b   : > { %3915 = vmatpush3.bf16.xpose.msra.mxu0 %v1662_v26  ;;  %3916 = vmatprep.mubr.msk.bf16.mxu0 %vm4318_vm2, %v4317_v2  ;;  %v1713_v44 = vsel %vm729_vm3, %v1708_v40, 0 }
 0x90c   : > { %3926 = vmatprep.subr.bf16.mxu0 %v4317_v2 }
 0x90e   : > { %v1706_v52 = vpop.permute.xlu0 %1705 }
 0x912   : > { %3917 = vmatmul.mubr.msk.bf16.vlgmr.msra.gmra.mrb[28].mxu0 %vm729_vm3, %v1655_v27 }
 0x913   : > { %3928 = vmatprep.mubr.msk.bf16.mxu0 %vm4318_vm2, %v4317_v2 }
 0x9d5   : > { %v1534_v30 = vpop.f32.mrb[24].mxu1 }
 0x9d6   : > { %v3900_v31 = vpop.f32.mrb[25].mxu1 }
 0x9d7   : > { %v1537_v32 = vpop.f32.mrb[26].mxu1 }
 0x9d8   : > { %v1588_v34 = vpack.c.bf16 %v1537_v32, %v1534_v30  ;;  %v3901_v37 = vpop.f32.mrb[27].mxu1 }
 0x9da   : > { %3910 = vmatprep.mubr.msk.bf16.mxu1 %vm729_vm3, %v1588_v34 }
 0x9dd   : > { %v1581_v38 = vpop.f32.mrb[24].mxu0 }
 0x9de   : > { %v3906_v39 = vpop.f32.mrb[25].mxu0 }
 0x9df   : > { %v1584_v41 = vpop.f32.mrb[26].mxu0 }
 0x9e0   : > { %v1589_v42 = vpack.c.bf16 %v1584_v41, %v1581_v38  ;;  %v3907_v43 = vpop.f32.mrb[27].mxu0 }
 0x9e2   : > { %3911 = vmatmul.mubr.msk.bf16.vlgmr.msra.gmra.mrb[20].mxu1 %vm729_vm3, %v1589_v42 }
 0x9e3   : > { %3921 = vmatpush3.bf16.xpose.msra.mxu1 %v1713_v44  ;;  %3922 = vmatprep.mubr.msk.bf16.mxu1 %vm4318_vm2, %v4317_v2 }
 0x9e4   : > { %3932 = vmatprep.subr.bf16.mxu1 %v4317_v2 }
 0x9e5   : > { %v1698_v45 = vpop.f32.mrb[28].mxu0 }
 0x9e6   : > { %v1756_v46 = vmul.f32 0.5, %v1698_v45  ;;  %v3918_v47 = vpop.f32.mrb[29].mxu0 }
 0x9e7   : > { %v1701_v48 = vpop.f32.mrb[30].mxu0 }
 0x9e8   : > { %v1757_v49 = vmul.f32 0.5, %v1701_v48  ;;  %v3919_v50 = vpop.f32.mrb[31].mxu0  ;;  %v1760_v51 = vsel %vm831_vm4, %v1756_v46, -inf }
 0x9e9   : > { %1761 = vmax.xlane.f32.xlu0 %v1760_v51 }
 0x9ea   : > { %3923 = vmatmul.mubr.msk.bf16.vlgmr.msra.gmra.mrb[28].mxu1 %vm729_vm3, %v1706_v52  ;;  %v1763_v53 = vsel %vm831_vm4, %v1757_v49, -inf }
 0x9eb   : > { %1764 = vmax.xlane.f32.xlu1 %v1763_v53  ;;  %3934 = vmatprep.mubr.msk.bf16.mxu1 %vm4318_vm2, %v4317_v2 }
 0x9fc   : > { %1806 = vrot.lane.b32.xlu1 %v4533_v8, %s4329_s25 }
 0xa00   : > { %1966 = vrot.lane.b32.xlu1 %v4533_v8, %s4330_s29 }
 0xa04   : > { %2019 = vrot.lane.b32.xlu1 %v4531_v6, %s4331_s28 }
 0xa76   : > { %v1762_v54 = vpop.xlane.xlu0 %1761 }
 0xa77   : > { %v1772_v55 = vsub.f32 %v1756_v46, %v1762_v54 }
 0xa78   : > { %v1765_v56 = vpop.xlane.xlu1 %1764 }
 0xa79   : > { %v1776_v57 = vmul.f32 1.442695, %v1772_v55  ;;  %v1773_v58 = vsub.f32 %v1757_v49, %v1765_v56 }
 0xa7b   : > { %4217 = vpow2.f32 %v1776_v57  ;;  %v1778_v59 = vmul.f32 1.442695, %v1773_v58 }
 0xa7c   : > { %v1807_v60 = vpop.permute.xlu1 %1806 }
 0xa7d   : > { %4219 = vpow2.f32 %v1778_v59  ;;  %3927 = vmatpush3.bf16.msra.mxu0 %v1807_v60 }
 0xa7e   : > { %3944 = vmatprep.subr.bf16.mxu0 %v4317_v2 }
 0xa80   : > { %v1967_v3 = vpop.permute.xlu1 %1966 }
 0xa84   : > { %v2020_v19 = vpop.permute.xlu1 %2019 }
 0xa85   : > { %v4218_v61 = vpop.eup %4217  ;;  %v2025_v20 = vsel %vm729_vm3, %v2020_v19, 0 }
 0xa86   : > { %v1784_v62 = vsel %vm831_vm4, %v4218_v61, 0.0 }
 0xa87   : > { %v4220_v0 = vpop.eup %4219  ;;  %1785 = vadd.xlane.f32.xlu0 %v1784_v62 }
 0xa88   : > { %v1787_v1 = vsel %vm831_vm4, %v4220_v0, 0.0 }
 0xa8b   : > { %1788 = vadd.xlane.f32.xlu0 %v1787_v1  ;;  %v3662_v1 = vld [vmem:[%s4438_s24 + $0x6] sm:$0x3] }
 0xaa1   : > { %1968 = vrot.lane.b32.xlu0 %v4533_v8, %s4331_s28 }
 0xaa5   : > { %2017 = vrot.lane.b32.xlu0 %v4531_v6, %s4330_s29 }
 0xabd   : > { %v1749_v4 = vpop.f32.mrb[28].mxu1 }
 0xabe   : > { %v1758_v7 = vmul.f32 0.5, %v1749_v4  ;;  %v3924_v9 = vpop.f32.mrb[29].mxu1  ;;  %v1911_v4 = vsel %vm1231_vm5, %v3662_v1, 0 }
 0xabf   : > { %v1752_v10 = vpop.f32.mrb[30].mxu1 }
 0xac0   : > { %v1759_v11 = vmul.f32 0.5, %v1752_v10  ;;  %v3925_v12 = vpop.f32.mrb[31].mxu1  ;;  %v1766_v13 = vsel %vm831_vm4, %v1758_v7, -inf }
 0xac1   : > { %1767 = vmax.xlane.f32.xlu1 %v1766_v13 }
 0xac2   : > { %v1769_v14 = vsel %vm831_vm4, %v1759_v11, -inf }
 0xac4   : > { %1770 = vmax.xlane.f32.xlu0 %v1769_v14 }
 0xb14   : > { %v1786_v16 = vpop.xlane.xlu0 %1785 }
 0xb15   : > { %4221 = vrcp.f32 %v1786_v16 }
 0xb18   : > { %v1789_v15 = vpop.xlane.xlu0 %1788 }
 0xb19   : > { %4223 = vrcp.f32 %v1789_v15 }
 0xb1c   : > { %v1969_v18 = vpop.permute.xlu0 %1968 }
 0xb1d   : > { %v1974_v5 = vsel %vm729_vm3, %v1969_v18, 0 }
 0xb1f   : > { %v4222_v17 = vpop.eup %4221 }
 0xb20   : > { %v1800_v35 = vmul.f32 %v4222_v17, %v4218_v61  ;;  %v2018_v21 = vpop.permute.xlu0 %2017 }
 0xb23   : > { %v4224_v33 = vpop.eup %4223 }
 0xb24   : > { %v1801_v36 = vmul.f32 %v4224_v33, %v4220_v0 }
 0xb26   : > { %v1804_v63 = vpack.c.bf16 %v1801_v36, %v1800_v35 }
 0xb28   : > { %3929 = vmatmul.mubr.msk.bf16.vlgmr.msra.gmra.mrb[32].mxu0 %vm831_vm4, %v1804_v63 }
 0xb29   : > { %3945 = vmatpush3.bf16.xpose.msra.mxu0 %v1974_v5  ;;  %3946 = vmatprep.mubr.msk.bf16.mxu0 %vm4318_vm2, %v4317_v2 }
 0xb2a   : > { %3950 = vmatprep.subr.bf16.mxu0 %v4317_v2 }
 0xb30   : > { %3947 = vmatmul.mubr.msk.bf16.vlgmr.msra.gmra.mrb[36].mxu0 %vm729_vm3, %v1967_v3 }
 0xb31   : > { %3951 = vmatpush3.bf16.xpose.msra.mxu0 %v2025_v20  ;;  %3952 = vmatprep.mubr.msk.bf16.mxu0 %vm4318_vm2, %v4317_v2 }
 0xb32   : > { %3962 = vmatprep.subr.bf16.mxu0 %v4317_v2 }
 0xb38   : > { %3953 = vmatmul.mubr.msk.bf16.vlgmr.msra.gmra.mrb[40].mxu0 %vm729_vm3, %v2018_v21 }
 0xb39   : > { %3964 = vmatprep.mubr.msk.bf16.mxu0 %vm4318_vm2, %v4317_v2 }
 0xb4e   : > { %v1768_v22 = vpop.xlane.xlu1 %1767 }
 0xb4f   : > { %v1774_v23 = vsub.f32 %v1758_v7, %v1768_v22 }
 0xb51   : > { %v1780_v24 = vmul.f32 1.442695, %v1774_v23  ;;  %v1771_v25 = vpop.xlane.xlu0 %1770 }
 0xb52   : > { %v1775_v26 = vsub.f32 %v1759_v11, %v1771_v25 }
 0xb53   : > { %4225 = vpow2.f32 %v1780_v24 }
 0xb54   : > { %v1782_v27 = vmul.f32 1.442695, %v1775_v26 }
 0xb56   : > { %4227 = vpow2.f32 %v1782_v27 }
 0xb5d   : > { %v4226_v28 = vpop.eup %4225 }
 0xb5e   : > { %v1790_v29 = vsel %vm831_vm4, %v4226_v28, 0.0 }
 0xb5f   : > { %1791 = vadd.xlane.f32.xlu0 %v1790_v29 }
 0xb60   : > { %v4228_v30 = vpop.eup %4227 }
 0xb61   : > { %v1793_v31 = vsel %vm831_vm4, %v4228_v30, 0.0 }
 0xb62   : > { %1794 = vadd.xlane.f32.xlu1 %v1793_v31 }
 0xb75   : > { %1853 = vrot.lane.b32.xlu0 %v4531_v6, %s4329_s25  ;;  %s4973_s25 = sld [smem:[#allocation5_spill]] }
 0xb7b   : > { %s4974_s29 = scalar_lea.vmem %s4973_s25, %s4415_s23 }
 0xbec   : > { %v1792_v32 = vpop.xlane.xlu0 %1791 }
 0xbed   : > { %4229 = vrcp.f32 %v1792_v32 }
 0xbef   : > { %v1795_v34 = vpop.xlane.xlu1 %1794 }
 0xbf0   : > { %4231 = vrcp.f32 %v1795_v34  ;;  %v1854_v37 = vpop.permute.xlu0 %1853 }
 0xbf1   : > { %3933 = vmatpush3.bf16.msra.mxu1 %v1854_v37 }
 0xbf2   : > { %4115 = vmatprep.subr.msk.bf16.mxu1 %vm1231_vm5, %v3662_v1 }
 0xbf7   : > { %v4230_v38 = vpop.eup %4229 }
 0xbf8   : > { %v1802_v40 = vmul.f32 %v4230_v38, %v4226_v28 }
 0xbfa   : > { %v4232_v39 = vpop.eup %4231 }
 0xbfb   : > { %v1803_v41 = vmul.f32 %v4232_v39, %v4228_v30  ;;  %v1846_v42 = vpop.f32.mrb[32].mxu0 }
 0xbfc   : > { %v3930_v43 = vpop.f32.mrb[33].mxu0 }
 0xbfd   : > { %v1849_v44 = vpop.f32.mrb[34].mxu0  ;;  %v1805_v45 = vpack.c.bf16 %v1803_v41, %v1802_v40 }
 0xbfe   : > { %v1900_v46 = vpack.c.bf16 %v1849_v44, %v1846_v42  ;;  %v3931_v47 = vpop.f32.mrb[35].mxu0 }
 0xbff   : > { %3935 = vmatmul.mubr.msk.bf16.vlgmr.msra.gmra.mrb[32].mxu1 %vm831_vm4, %v1805_v45 }
 0xc00   : > { %3940 = vmatprep.mubr.msk.bf16.mxu1 %vm729_vm3, %v1900_v46  ;;  %3939 = vmatpush3.bf16.msra.mxu1 %v1911_v4 }
 0xc01   : > { %3956 = vmatprep.subr.bf16.mxu1 %v4317_v2 }
 0xc03   : > { %v2010_v48 = vpop.f32.mrb[36].mxu0 }
 0xc04   : > { %v2068_v49 = vmul.f32 0.5, %v2010_v48  ;;  %v3948_v50 = vpop.f32.mrb[37].mxu0 }
 0xc05   : > { %v2013_v51 = vpop.f32.mrb[38].mxu0 }
 0xc06   : > { %v2069_v52 = vmul.f32 0.5, %v2013_v51  ;;  %v3949_v53 = vpop.f32.mrb[39].mxu0  ;;  %v2072_v54 = vsel %vm831_vm4, %v2068_v49, -inf }
 0xc07   : > { %2073 = vmax.xlane.f32.xlu1 %v2072_v54 }
 0xc08   : > { %v2075_v55 = vsel %vm831_vm4, %v2069_v52, -inf }
 0xc0b   : > { %2076 = vmax.xlane.f32.xlu1 %v2075_v55  ;;  %v2061_v56 = vpop.f32.mrb[40].mxu0 }
 0xc0c   : > { %v2070_v57 = vmul.f32 0.5, %v2061_v56  ;;  %v3954_v58 = vpop.f32.mrb[41].mxu0 }
 0xc0d   : > { %v2064_v59 = vpop.f32.mrb[42].mxu0 }
 0xc0e   : > { %v2071_v60 = vmul.f32 0.5, %v2064_v59  ;;  %v3955_v61 = vpop.f32.mrb[43].mxu0  ;;  %v2078_v62 = vsel %vm831_vm4, %v2070_v57, -inf }
 0xc0f   : > { %2079 = vmax.xlane.f32.xlu1 %v2078_v62 }
 0xc10   : > { %v2081_v0 = vsel %vm831_vm4, %v2071_v60, -inf }
 0xc13   : > { %2082 = vmax.xlane.f32.xlu1 %v2081_v0 }
 0xc94   : > { %v2074_v7 = vpop.xlane.xlu1 %2073 }
 0xc95   : > { %v2084_v9 = vsub.f32 %v2068_v49, %v2074_v7  ;;  %v3669_v49 = vld [vmem:[%s4438_s24 + $0x8] sm:$0x3] }
 0xc96   : > { %v2223_v50 = vsel %vm1231_vm5, %v3669_v49, 0 }
 0xc97   : > { %v2088_v10 = vmul.f32 1.442695, %v2084_v9 }
 0xc98   : > { %v2077_v11 = vpop.xlane.xlu1 %2076 }
 0xc99   : > { %4233 = vpow2.f32 %v2088_v10  ;;  %v2085_v12 = vsub.f32 %v2069_v52, %v2077_v11 }
 0xc9b   : > { %v2090_v13 = vmul.f32 1.442695, %v2085_v12 }
 0xc9c   : > { %v2080_v14 = vpop.xlane.xlu1 %2079 }
 0xc9d   : > { %4235 = vpow2.f32 %v2090_v13  ;;  %v2086_v16 = vsub.f32 %v2070_v57, %v2080_v14 }
 0xc9f   : > { %v2092_v15 = vmul.f32 1.442695, %v2086_v16 }
 0xca0   : > { %v2083_v3 = vpop.xlane.xlu1 %2082 }
 0xca1   : > { %4237 = vpow2.f32 %v2092_v15  ;;  %v2087_v5 = vsub.f32 %v2071_v60, %v2083_v3 }
 0xca3   : > { %v4234_v17 = vpop.eup %4233  ;;  %v2094_v19 = vmul.f32 1.442695, %v2087_v5 }
 0xca4   : > { %v2096_v33 = vsel %vm831_vm4, %v4234_v17, 0.0 }
 0xca5   : > { %2097 = vadd.xlane.f32.xlu1 %v2096_v33  ;;  %4239 = vpow2.f32 %v2094_v19 }
 0xca7   : > { %v4236_v35 = vpop.eup %4235 }
 0xca8   : > { %v2099_v36 = vsel %vm831_vm4, %v4236_v35, 0.0 }
 0xca9   : > { %2100 = vadd.xlane.f32.xlu1 %v2099_v36 }
 0xcab   : > { %v4238_v18 = vpop.eup %4237 }
 0xcac   : > { %v2102_v63 = vsel %vm831_vm4, %v4238_v18, 0.0 }
 0xcad   : > { %2103 = vadd.xlane.f32.xlu0 %v2102_v63 }
 0xcaf   : > { %v4240_v25 = vpop.eup %4239 }
 0xcb0   : > { %v2105_v26 = vsel %vm831_vm4, %v4240_v25, 0.0 }
 0xcba   : > { %2118 = vrot.lane.b32.xlu1 %v4533_v8, %s4332_s30 }
 0xcc3   : > { %2278 = vrot.lane.b32.xlu0 %v4533_v8, %s4333_s13 }
 0xcd2   : > { %v1893_v20 = vpop.f32.mrb[32].mxu1 }
 0xcd3   : > { %v3936_v21 = vpop.f32.mrb[33].mxu1 }
 0xcd4   : > { %v1896_v22 = vpop.f32.mrb[34].mxu1 }
 0xcd5   : > { %v1901_v23 = vpack.c.bf16 %v1896_v22, %v1893_v20  ;;  %v3937_v24 = vpop.f32.mrb[35].mxu1 }
 0xcd7   : > { %3941 = vmatmul.mubr.msk.bf16.vlgmr.msra.gmra.mrb[20].mxu1 %vm729_vm3, %v1901_v23 }
 0xcd8   : > { %3958 = vmatprep.mubr.msk.bf16.mxu1 %vm4318_vm2, %v4317_v2 }
 0xcde   : > { %2106 = vadd.xlane.f32.xlu1 %v2105_v26 }
 0xcef   : > { %2165 = vrot.lane.b32.xlu1 %v4531_v6, %s4332_s30 }
 0xcf3   : > { %2280 = vrot.lane.b32.xlu1 %v4533_v8, %s4334_s14 }
 0xcf7   : > { %2331 = vrot.lane.b32.xlu1 %v4531_v6, %s4334_s14 }
 0xcfb   : > { %2329 = vrot.lane.b32.xlu1 %v4531_v6, %s4333_s13 }
 0xd32   : > { %v2098_v27 = vpop.xlane.xlu1 %2097 }
 0xd33   : > { %4241 = vrcp.f32 %v2098_v27 }
 0xd36   : > { %v2101_v28 = vpop.xlane.xlu1 %2100 }
 0xd37   : > { %4243 = vrcp.f32 %v2101_v28 }
 0xd3a   : > { %v2119_v29 = vpop.permute.xlu1 %2118  ;;  %v2104_v38 = vpop.xlane.xlu0 %2103 }
 0xd3b   : > { %3957 = vmatpush3.bf16.msra.mxu1 %v2119_v29  ;;  %4245 = vrcp.f32 %v2104_v38 }
 0xd3c   : > { %4116 = vmatprep.subr.msk.bf16.mxu1 %vm1231_vm5, %v3669_v49 }
 0xd3d   : > { %v4242_v30 = vpop.eup %4241 }
 0xd3e   : > { %v2112_v32 = vmul.f32 %v4242_v30, %v4234_v17  ;;  %v2279_v48 = vpop.permute.xlu0 %2278 }
 0xd41   : > { %v4244_v31 = vpop.eup %4243 }
 0xd42   : > { %v2113_v34 = vmul.f32 %v4244_v31, %v4236_v35 }
 0xd44   : > { %v2116_v37 = vpack.c.bf16 %v2113_v34, %v2112_v32 }
 0xd45   : > { %v4246_v41 = vpop.eup %4245 }
 0xd46   : > { %3959 = vmatmul.mubr.msk.bf16.vlgmr.msra.gmra.mrb[36].mxu1 %vm831_vm4, %v2116_v37  ;;  %v2114_v43 = vmul.f32 %v4246_v41, %v4238_v18 }
 0xd47   : > { %3969 = vmatpush3.bf16.msra.mxu1 %v2223_v50 }
 0xd48   : > { %3980 = vmatprep.subr.bf16.mxu1 %v4317_v2 }
 0xd6b   : > { %v2107_v39 = vpop.xlane.xlu1 %2106 }
 0xd6c   : > { %4247 = vrcp.f32 %v2107_v39 }
 0xd6f   : > { %v2166_v40 = vpop.permute.xlu1 %2165 }
 0xd70   : > { %3963 = vmatpush3.bf16.msra.mxu0 %v2166_v40 }
 0xd71   : > { %3974 = vmatprep.subr.bf16.mxu0 %v4317_v2 }
 0xd73   : > { %v2281_v45 = vpop.permute.xlu1 %2280 }
 0xd74   : > { %v2286_v47 = vsel %vm729_vm3, %v2281_v45, 0 }
 0xd76   : > { %v4248_v42 = vpop.eup %4247 }
 0xd77   : > { %v2115_v44 = vmul.f32 %v4248_v42, %v4240_v25  ;;  %v2332_v58 = vpop.permute.xlu1 %2331 }
 0xd78   : > { %v2337_v62 = vsel %vm729_vm3, %v2332_v58, 0 }
 0xd79   : > { %v2117_v46 = vpack.c.bf16 %v2115_v44, %v2114_v43 }
 0xd7b   : > { %3965 = vmatmul.mubr.msk.bf16.vlgmr.msra.gmra.mrb[44].mxu0 %vm831_vm4, %v2117_v46  ;;  %v2330_v12 = vpop.permute.xlu1 %2329 }
 0xd7c   : > { %3975 = vmatpush3.bf16.xpose.msra.mxu0 %v2286_v47  ;;  %3976 = vmatprep.mubr.msk.bf16.mxu0 %vm4318_vm2, %v4317_v2 }
 0xd7d   : > { %3986 = vmatprep.subr.bf16.mxu0 %v4317_v2 }
 0xd83   : > { %3977 = vmatmul.mubr.msk.bf16.vlgmr.msra.gmra.mrb[48].mxu0 %vm729_vm3, %v2279_v48 }
 0xd84   : > { %3988 = vmatprep.mubr.msk.bf16.mxu0 %vm4318_vm2, %v4317_v2 }
 0xe19   : > { %v2158_v51 = vpop.f32.mrb[36].mxu1 }
 0xe1a   : > { %v3960_v52 = vpop.f32.mrb[37].mxu1 }
 0xe1b   : > { %v2161_v53 = vpop.f32.mrb[38].mxu1 }
 0xe1c   : > { %v2212_v54 = vpack.c.bf16 %v2161_v53, %v2158_v51  ;;  %v3961_v55 = vpop.f32.mrb[39].mxu1 }
 0xe1e   : > { %3970 = vmatprep.mubr.msk.bf16.mxu1 %vm729_vm3, %v2212_v54 }
 0xe4e   : > { %v2205_v56 = vpop.f32.mrb[44].mxu0 }
 0xe4f   : > { %v3966_v57 = vpop.f32.mrb[45].mxu0 }
 0xe50   : > { %v2208_v59 = vpop.f32.mrb[46].mxu0 }
 0xe51   : > { %v2213_v60 = vpack.c.bf16 %v2208_v59, %v2205_v56  ;;  %v3967_v61 = vpop.f32.mrb[47].mxu0 }
 0xe53   : > { %3971 = vmatmul.mubr.msk.bf16.vlgmr.msra.gmra.mrb[20].mxu1 %vm729_vm3, %v2213_v60 }
 0xe54   : > { %3981 = vmatpush3.bf16.xpose.msra.mxu1 %v2337_v62  ;;  %3982 = vmatprep.mubr.msk.bf16.mxu1 %vm4318_vm2, %v4317_v2 }
 0xe55   : > { %3992 = vmatprep.subr.bf16.mxu1 %v4317_v2 }
 0xe56   : > { %v2322_v0 = vpop.f32.mrb[48].mxu0 }
 0xe57   : > { %v2380_v1 = vmul.f32 0.5, %v2322_v0  ;;  %v3978_v4 = vpop.f32.mrb[49].mxu0 }
 0xe58   : > { %v2325_v7 = vpop.f32.mrb[50].mxu0 }
 0xe59   : > { %v2381_v9 = vmul.f32 0.5, %v2325_v7  ;;  %v3979_v10 = vpop.f32.mrb[51].mxu0  ;;  %v2384_v11 = vsel %vm831_vm4, %v2380_v1, -inf }
 0xe5a   : > { %2385 = vmax.xlane.f32.xlu1 %v2384_v11 }
 0xe5b   : > { %3983 = vmatmul.mubr.msk.bf16.vlgmr.msra.gmra.mrb[40].mxu1 %vm729_vm3, %v2330_v12  ;;  %v2387_v13 = vsel %vm831_vm4, %v2381_v9, -inf }
 0xe5c   : > { %2388 = vmax.xlane.f32.xlu0 %v2387_v13  ;;  %3994 = vmatprep.mubr.msk.bf16.mxu1 %vm4318_vm2, %v4317_v2 }
 0xe6b   : > { %2592 = vrot.lane.b32.xlu1 %v4533_v8, %s4335_s16 }
 0xe72   : > { %2430 = vrot.lane.b32.xlu0 %v4533_v8, %s4336_s4 }
 0xe76   : > { %2641 = vrot.lane.b32.xlu0 %v4531_v6, %s4337_s17 }
 0xee7   : > { %v2386_v14 = vpop.xlane.xlu1 %2385 }
 0xee8   : > { %v2396_v16 = vsub.f32 %v2380_v1, %v2386_v14 }
 0xee9   : > { %v2389_v15 = vpop.xlane.xlu0 %2388 }
 0xeea   : > { %v2400_v17 = vmul.f32 1.442695, %v2396_v16  ;;  %v2397_v33 = vsub.f32 %v2381_v9, %v2389_v15 }
 0xeeb   : > { %v2593_v27 = vpop.permute.xlu1 %2592 }
 0xeec   : > { %4249 = vpow2.f32 %v2400_v17  ;;  %v2402_v35 = vmul.f32 1.442695, %v2397_v33  ;;  %v2598_v39 = vsel %vm729_vm3, %v2593_v27, 0 }
 0xeed   : > { %v2431_v36 = vpop.permute.xlu0 %2430 }
 0xeee   : > { %4251 = vpow2.f32 %v2402_v35  ;;  %3987 = vmatpush3.bf16.msra.mxu0 %v2431_v36 }
 0xeef   : > { %4004 = vmatprep.subr.bf16.mxu0 %v4317_v2 }
 0xef1   : > { %v2642_v42 = vpop.permute.xlu0 %2641 }
 0xef6   : > { %v4250_v18 = vpop.eup %4249 }
 0xef7   : > { %v2408_v63 = vsel %vm831_vm4, %v4250_v18, 0.0 }
 0xef8   : > { %v4252_v3 = vpop.eup %4251  ;;  %2409 = vadd.xlane.f32.xlu1 %v2408_v63 }
 0xef9   : > { %v2411_v5 = vsel %vm831_vm4, %v4252_v3, 0.0 }
 0xefc   : > { %2412 = vadd.xlane.f32.xlu1 %v2411_v5  ;;  %v3676_v5 = vld [vmem:[%s4438_s24 + $0xa] sm:$0x3] }
 0xf0d   : > { %2590 = vrot.lane.b32.xlu1 %v4533_v8, %s4337_s17 }
 0xf11   : > { %2643 = vrot.lane.b32.xlu1 %v4531_v6, %s4335_s16 }
 0xf2e   : > { %v2373_v19 = vpop.f32.mrb[40].mxu1 }
 0xf2f   : > { %v3984_v20 = vpop.f32.mrb[41].mxu1  ;;  %v2382_v21 = vmul.f32 0.5, %v2373_v19  ;;  %v2535_v19 = vsel %vm1231_vm5, %v3676_v5, 0 }
 0xf30   : > { %v2376_v22 = vpop.f32.mrb[42].mxu1 }
 0xf31   : > { %v2383_v23 = vmul.f32 0.5, %v2376_v22  ;;  %v3985_v24 = vpop.f32.mrb[43].mxu1  ;;  %v2390_v26 = vsel %vm831_vm4, %v2382_v21, -inf }
 0xf33   : > { %v2393_v25 = vsel %vm831_vm4, %v2383_v23, -inf }
 0xf34   : > { %2394 = vmax.xlane.f32.xlu0 %v2393_v25 }
 0xf35   : > { %2391 = vmax.xlane.f32.xlu1 %v2390_v26 }
 0xf46   : > { %2477 = vrot.lane.b32.xlu1 %v4531_v6, %s4336_s4 }
 0xf85   : > { %v2410_v28 = vpop.xlane.xlu1 %2409 }
 0xf86   : > { %4253 = vrcp.f32 %v2410_v28 }
 0xf89   : > { %v2413_v29 = vpop.xlane.xlu1 %2412 }
 0xf8a   : > { %4255 = vrcp.f32 %v2413_v29 }
 0xf8d   : > { %v2591_v38 = vpop.permute.xlu1 %2590 }
 0xf90   : > { %v4254_v30 = vpop.eup %4253 }
 0xf91   : > { %v2424_v32 = vmul.f32 %v4254_v30, %v4250_v18  ;;  %v2644_v40 = vpop.permute.xlu1 %2643 }
 0xf92   : > { %v2649_v41 = vsel %vm729_vm3, %v2644_v40, 0 }
 0xf94   : > { %v4256_v31 = vpop.eup %4255 }
 0xf95   : > { %v2425_v34 = vmul.f32 %v4256_v31, %v4252_v3 }
 0xf97   : > { %v2428_v37 = vpack.c.bf16 %v2425_v34, %v2424_v32 }
 0xf99   : > { %3989 = vmatmul.mubr.msk.bf16.vlgmr.msra.gmra.mrb[52].mxu0 %vm831_vm4, %v2428_v37 }
 0xf9a   : > { %4005 = vmatpush3.bf16.xpose.msra.mxu0 %v2598_v39  ;;  %4006 = vmatprep.mubr.msk.bf16.mxu0 %vm4318_vm2, %v4317_v2 }
 0xf9b   : > { %4010 = vmatprep.subr.bf16.mxu0 %v4317_v2 }
 0xfa1   : > { %4007 = vmatmul.mubr.msk.bf16.vlgmr.msra.gmra.mrb[56].mxu0 %vm729_vm3, %v2591_v38 }
 0xfa2   : > { %4011 = vmatpush3.bf16.xpose.msra.mxu0 %v2649_v41  ;;  %4012 = vmatprep.mubr.msk.bf16.mxu0 %vm4318_vm2, %v4317_v2 }
 0xfa3   : > { %4022 = vmatprep.subr.bf16.mxu0 %v4317_v2 }
 0xfa9   : > { %4013 = vmatmul.mubr.msk.bf16.vlgmr.msra.gmra.mrb[60].mxu0 %vm729_vm3, %v2642_v42 }
 0xfaa   : > { %4024 = vmatprep.mubr.msk.bf16.mxu0 %vm4318_vm2, %v4317_v2 }
 0xfc1   : > { %v2395_v43 = vpop.xlane.xlu0 %2394 }
 0xfc2   : > { %v2399_v44 = vsub.f32 %v2383_v23, %v2395_v43  ;;  %v2392_v45 = vpop.xlane.xlu1 %2391 }
 0xfc3   : > { %v2398_v46 = vsub.f32 %v2382_v21, %v2392_v45 }
 0xfc4   : > { %v2406_v47 = vmul.f32 1.442695, %v2399_v44 }
 0xfc5   : > { %v2404_v48 = vmul.f32 1.442695, %v2398_v46 }
 0xfc6   : > { %v2478_v49 = vpop.permute.xlu1 %2477 }
 0xfc7   : > { %4257 = vpow2.f32 %v2404_v48  ;;  %3993 = vmatpush3.bf16.msra.mxu1 %v2478_v49 }
 0xfc8   : > { %4259 = vpow2.f32 %v2406_v47  ;;  %4117 = vmatprep.subr.msk.bf16.mxu1 %vm1231_vm5, %v3676_v5 }
 0xfd1   : > { %v4258_v50 = vpop.eup %4257 }
 0xfd2   : > { %v2414_v51 = vsel %vm831_vm4, %v4258_v50, 0.0  ;;  %v4260_v52 = vpop.eup %4259 }
 0xfd3   : > { %2415 = vadd.xlane.f32.xlu0 %v2414_v51  ;;  %v2417_v53 = vsel %vm831_vm4, %v4260_v52, 0.0 }
 0xfd7   : > { %2418 = vadd.xlane.f32.xlu0 %v2417_v53 }
0x1060   : > { %v2416_v54 = vpop.xlane.xlu0 %2415 }
0x1061   : > { %4261 = vrcp.f32 %v2416_v54 }
0x1064   : > { %v2419_v55 = vpop.xlane.xlu0 %2418 }
0x1065   : > { %4263 = vrcp.f32 %v2419_v55 }
0x106b   : > { %v4262_v57 = vpop.eup %4261 }
0x106c   : > { %v2470_v56 = vpop.f32.mrb[52].mxu0  ;;  %v2426_v0 = vmul.f32 %v4262_v57, %v4258_v50 }
0x106d   : > { %v3990_v58 = vpop.f32.mrb[53].mxu0 }
0x106e   : > { %v2473_v59 = vpop.f32.mrb[54].mxu0 }
0x106f   : > { %v4264_v60 = vpop.eup %4263  ;;  %v2524_v61 = vpack.c.bf16 %v2473_v59, %v2470_v56  ;;  %v3991_v62 = vpop.f32.mrb[55].mxu0 }
0x1070   : > { %v2427_v1 = vmul.f32 %v4264_v60, %v4260_v52 }
0x1072   : > { %v2429_v4 = vpack.c.bf16 %v2427_v1, %v2426_v0 }
0x1074   : > { %3995 = vmatmul.mubr.msk.bf16.vlgmr.msra.gmra.mrb[44].mxu1 %vm831_vm4, %v2429_v4  ;;  %v2634_v7 = vpop.f32.mrb[56].mxu0 }
0x1075   : > { %v2692_v9 = vmul.f32 0.5, %v2634_v7  ;;  %4000 = vmatprep.mubr.msk.bf16.mxu1 %vm729_vm3, %v2524_v61  ;;  %v4008_v10 = vpop.f32.mrb[57].mxu0  ;;  %3999 = vmatpush3.bf16.msra.mxu1 %v2535_v19 }
0x1076   : > { %v2637_v11 = vpop.f32.mrb[58].mxu0  ;;  %4016 = vmatprep.subr.bf16.mxu1 %v4317_v2  ;;  %v3683_v10 = vld [vmem:[%s4438_s24 + $0xc] sm:$0x3] }
0x1077   : > { %v2693_v12 = vmul.f32 0.5, %v2637_v11  ;;  %v4009_v13 = vpop.f32.mrb[59].mxu0  ;;  %v2696_v14 = vsel %vm831_vm4, %v2692_v9, -inf  ;;  %v2847_v11 = vsel %vm1231_vm5, %v3683_v10, 0 }
0x1078   : > { %2697 = vmax.xlane.f32.xlu0 %v2696_v14 }
0x1079   : > { %v2699_v16 = vsel %vm831_vm4, %v2693_v12, -inf }
0x107c   : > { %2700 = vmax.xlane.f32.xlu0 %v2699_v16  ;;  %v2685_v15 = vpop.f32.mrb[60].mxu0 }
0x107d   : > { %v2694_v17 = vmul.f32 0.5, %v2685_v15  ;;  %v4014_v33 = vpop.f32.mrb[61].mxu0 }
0x107e   : > { %v2688_v35 = vpop.f32.mrb[62].mxu0 }
0x107f   : > { %v2695_v36 = vmul.f32 0.5, %v2688_v35  ;;  %v4015_v18 = vpop.f32.mrb[63].mxu0  ;;  %v2702_v63 = vsel %vm831_vm4, %v2694_v17, -inf }
0x1080   : > { %2703 = vmax.xlane.f32.xlu0 %v2702_v63 }
0x1081   : > { %v2705_v3 = vsel %vm831_vm4, %v2695_v36, -inf }
0x1084   : > { %2706 = vmax.xlane.f32.xlu0 %v2705_v3 }
0x1105   : > { %v2698_v20 = vpop.xlane.xlu0 %2697 }
0x1106   : > { %v2708_v21 = vsub.f32 %v2692_v9, %v2698_v20 }
0x1108   : > { %v2712_v22 = vmul.f32 1.442695, %v2708_v21 }
0x1109   : > { %v2701_v23 = vpop.xlane.xlu0 %2700 }
0x110a   : > { %4265 = vpow2.f32 %v2712_v22  ;;  %v2709_v24 = vsub.f32 %v2693_v12, %v2701_v23 }
0x110c   : > { %v2714_v25 = vmul.f32 1.442695, %v2709_v24 }
0x110d   : > { %v2704_v26 = vpop.xlane.xlu0 %2703 }
0x110e   : > { %4267 = vpow2.f32 %v2714_v25  ;;  %v2710_v27 = vsub.f32 %v2694_v17, %v2704_v26 }
0x1110   : > { %v2716_v28 = vmul.f32 1.442695, %v2710_v27 }
0x1111   : > { %v2707_v29 = vpop.xlane.xlu0 %2706 }
0x1112   : > { %4269 = vpow2.f32 %v2716_v28  ;;  %v2711_v30 = vsub.f32 %v2695_v36, %v2707_v29 }
0x1114   : > { %v4266_v31 = vpop.eup %4265  ;;  %v2718_v32 = vmul.f32 1.442695, %v2711_v30 }
0x1115   : > { %v2720_v34 = vsel %vm831_vm4, %v4266_v31, 0.0 }
0x1116   : > { %4271 = vpow2.f32 %v2718_v32  ;;  %2721 = vadd.xlane.f32.xlu1 %v2720_v34 }
0x1118   : > { %v4268_v37 = vpop.eup %4267 }
0x1119   : > { %v2723_v38 = vsel %vm831_vm4, %v4268_v37, 0.0 }
0x111a   : > { %2724 = vadd.xlane.f32.xlu0 %v2723_v38 }
0x111c   : > { %v4270_v39 = vpop.eup %4269 }
0x111d   : > { %v2726_v40 = vsel %vm831_vm4, %v4270_v39, 0.0 }
0x111e   : > { %2727 = vadd.xlane.f32.xlu0 %v2726_v40 }
0x1120   : > { %v4272_v41 = vpop.eup %4271 }
0x1121   : > { %v2729_v42 = vsel %vm831_vm4, %v4272_v41, 0.0 }
0x1122   : > { %2730 = vadd.xlane.f32.xlu0 %v2729_v42 }
0x1127   : > { %2789 = vrot.lane.b32.xlu1 %v4531_v6, %s4338_s19 }
0x1138   : > { %2742 = vrot.lane.b32.xlu0 %v4533_v8, %s4338_s19 }
0x113c   : > { %2904 = vrot.lane.b32.xlu0 %v4533_v8, %s4339_s22 }
0x1140   : > { %2955 = vrot.lane.b32.xlu0 %v4531_v6, %s4339_s22 }
0x1144   : > { %2902 = vrot.lane.b32.xlu0 %v4533_v8, %s4340_s20 }
0x1147   : > { %v2517_v43 = vpop.f32.mrb[44].mxu1 }
0x1148   : > { %v3996_v44 = vpop.f32.mrb[45].mxu1  ;;  %2953 = vrot.lane.b32.xlu0 %v4531_v6, %s4340_s20  ;;  %s4975_s20 = scalar_lea.vmem %s4956_s6, %s4415_s23 }
0x1149   : > { %v2520_v45 = vpop.f32.mrb[46].mxu1 }
0x114a   : > { %v2525_v46 = vpack.c.bf16 %v2520_v45, %v2517_v43  ;;  %v3997_v47 = vpop.f32.mrb[47].mxu1 }
0x114c   : > { %4001 = vmatmul.mubr.msk.bf16.vlgmr.msra.gmra.mrb[20].mxu1 %vm729_vm3, %v2525_v46 }
0x114d   : > { %4018 = vmatprep.mubr.msk.bf16.mxu1 %vm4318_vm2, %v4317_v2 }
0x11a3   : > { %v2722_v48 = vpop.xlane.xlu1 %2721 }
0x11a4   : > { %4273 = vrcp.f32 %v2722_v48 }
0x11a7   : > { %v2790_v49 = vpop.permute.xlu1 %2789  ;;  %v2725_v50 = vpop.xlane.xlu0 %2724 }
0x11a8   : > { %4275 = vrcp.f32 %v2725_v50  ;;  %4023 = vmatpush3.bf16.msra.mxu0 %v2790_v49 }
0x11a9   : > { %4034 = vmatprep.subr.bf16.mxu0 %v4317_v2 }
0x11ab   : > { %v2728_v51 = vpop.xlane.xlu0 %2727 }
0x11ac   : > { %4277 = vrcp.f32 %v2728_v51 }
0x11ae   : > { %v4274_v53 = vpop.eup %4273 }
0x11af   : > { %v2731_v52 = vpop.xlane.xlu0 %2730  ;;  %v2736_v55 = vmul.f32 %v4274_v53, %v4266_v31 }
0x11b0   : > { %4279 = vrcp.f32 %v2731_v52 }
0x11b2   : > { %v4276_v54 = vpop.eup %4275 }
0x11b3   : > { %v2737_v56 = vmul.f32 %v4276_v54, %v4268_v37  ;;  %v2743_v57 = vpop.permute.xlu0 %2742 }
0x11b4   : > { %4017 = vmatpush3.bf16.msra.mxu1 %v2743_v57 }
0x11b5   : > { %v2740_v58 = vpack.c.bf16 %v2737_v56, %v2736_v55  ;;  %4118 = vmatprep.subr.msk.bf16.mxu1 %vm1231_vm5, %v3683_v10 }
0x11b6   : > { %v4278_v59 = vpop.eup %4277 }
0x11b7   : > { %4019 = vmatmul.mubr.msk.bf16.vlgmr.msra.gmra.mrb[48].mxu1 %vm831_vm4, %v2740_v58  ;;  %v2905_v61 = vpop.permute.xlu0 %2904  ;;  %v2738_v62 = vmul.f32 %v4278_v59, %v4270_v39 }
0x11b8   : > { %v2910_v4 = vsel %vm729_vm3, %v2905_v61, 0  ;;  %4029 = vmatpush3.bf16.msra.mxu1 %v2847_v11 }
0x11b9   : > { %4040 = vmatprep.subr.bf16.mxu1 %v4317_v2 }
0x11ba   : > { %v4280_v60 = vpop.eup %4279 }
0x11bb   : > { %v2739_v0 = vmul.f32 %v4280_v60, %v4272_v41  ;;  %v2956_v7 = vpop.permute.xlu0 %2955 }
0x11bc   : > { %v2961_v63 = vsel %vm729_vm3, %v2956_v7, 0 }
0x11bd   : > { %v2741_v1 = vpack.c.bf16 %v2739_v0, %v2738_v62 }
0x11bf   : > { %4025 = vmatmul.mubr.msk.bf16.vlgmr.msra.gmra.mrb[64].mxu0 %vm831_vm4, %v2741_v1  ;;  %v2903_v9 = vpop.permute.xlu0 %2902 }
0x11c0   : > { %4035 = vmatpush3.bf16.xpose.msra.mxu0 %v2910_v4  ;;  %4036 = vmatprep.mubr.msk.bf16.mxu0 %vm4318_vm2, %v4317_v2 }
0x11c1   : > { %4046 = vmatprep.subr.bf16.mxu0 %v4317_v2 }
0x11c3   : > { %v2954_v24 = vpop.permute.xlu0 %2953 }
0x11c7   : > { %4037 = vmatmul.mubr.msk.bf16.vlgmr.msra.gmra.mrb[68].mxu0 %vm729_vm3, %v2903_v9 }
0x11c8   : > { %4048 = vmatprep.mubr.msk.bf16.mxu0 %vm4318_vm2, %v4317_v2 }
0x128a   : > { %v2782_v12 = vpop.f32.mrb[48].mxu1 }
0x128b   : > { %v4020_v13 = vpop.f32.mrb[49].mxu1 }
0x128c   : > { %v2785_v14 = vpop.f32.mrb[50].mxu1 }
0x128d   : > { %v2836_v16 = vpack.c.bf16 %v2785_v14, %v2782_v12  ;;  %v4021_v15 = vpop.f32.mrb[51].mxu1  ;;  %v3690_v12 = vld [vmem:[%s4438_s24 + $0xe] sm:$0x3] }
0x128e   : > { %v3159_v13 = vsel %vm1231_vm5, %v3690_v12, 0 }
0x128f   : > { %4030 = vmatprep.mubr.msk.bf16.mxu1 %vm729_vm3, %v2836_v16 }
0x1292   : > { %v2829_v17 = vpop.f32.mrb[64].mxu0 }
0x1293   : > { %v4026_v33 = vpop.f32.mrb[65].mxu0 }
0x1294   : > { %v2832_v35 = vpop.f32.mrb[66].mxu0 }
0x1295   : > { %v2837_v36 = vpack.c.bf16 %v2832_v35, %v2829_v17  ;;  %v4027_v18 = vpop.f32.mrb[67].mxu0 }
0x1297   : > { %4031 = vmatmul.mubr.msk.bf16.vlgmr.msra.gmra.mrb[20].mxu1 %vm729_vm3, %v2837_v36 }
0x1298   : > { %4041 = vmatpush3.bf16.xpose.msra.mxu1 %v2961_v63  ;;  %4042 = vmatprep.mubr.msk.bf16.mxu1 %vm4318_vm2, %v4317_v2 }
0x1299   : > { %4052 = vmatprep.subr.bf16.mxu1 %v4317_v2 }
0x129a   : > { %v2946_v3 = vpop.f32.mrb[68].mxu0 }
0x129b   : > { %v3004_v5 = vmul.f32 0.5, %v2946_v3  ;;  %v4038_v19 = vpop.f32.mrb[69].mxu0 }
0x129c   : > { %v2949_v20 = vpop.f32.mrb[70].mxu0  ;;  %v3693_v19 = vld [vmem:[%s4974_s29] ss:$0 sm:$0xff] }
0x129d   : > { %v3005_v21 = vmul.f32 0.5, %v2949_v20  ;;  %v4039_v22 = vpop.f32.mrb[71].mxu0  ;;  %v3008_v23 = vsel %vm831_vm4, %v3004_v5, -inf }
0x129e   : > { %3009 = vmax.xlane.f32.xlu0 %v3008_v23  ;;  %v4306_v23 = vld [vmem:[%s4962_s12] sm:$0xff] }
0x129f   : > { %4043 = vmatmul.mubr.msk.bf16.vlgmr.msra.gmra.mrb[52].mxu1 %vm729_vm3, %v2954_v24  ;;  %v3011_v25 = vsel %vm831_vm4, %v3005_v21, -inf }
0x12a0   : > { %3012 = vmax.xlane.f32.xlu1 %v3011_v25  ;;  %4054 = vmatprep.mubr.msk.bf16.mxu1 %vm4318_vm2, %v4317_v2 }
0x132b   : > { %v3010_v26 = vpop.xlane.xlu0 %3009 }
0x132c   : > { %v3020_v27 = vsub.f32 %v3004_v5, %v3010_v26 }
0x132d   : > { %v3013_v31 = vpop.xlane.xlu1 %3012 }
0x132e   : > { %v3024_v28 = vmul.f32 1.442695, %v3020_v27  ;;  %v3021_v32 = vsub.f32 %v3005_v21, %v3013_v31  ;;  %v4305_v21 = vld [vmem:[%s4962_s12 + $0x10] sm:$0xff] }
0x1330   : > { %4281 = vpow2.f32 %v3024_v28  ;;  %v3026_v34 = vmul.f32 1.442695, %v3021_v32  ;;  %v4307_v28 = vld [vmem:[%s4962_s12 + $0x18] sm:$0xff] }
0x1332   : > { %4283 = vpow2.f32 %v3026_v34 }
0x133a   : > { %v4282_v29 = vpop.eup %4281 }
0x133b   : > { %v3032_v30 = vsel %vm831_vm4, %v4282_v29, 0.0 }
0x133c   : > { %3033 = vadd.xlane.f32.xlu1 %v3032_v30  ;;  %v4284_v44 = vpop.eup %4283  ;;  %v4308_v30 = vld [vmem:[%s4962_s12 + $0x8] sm:$0xff] }
0x133d   : > { %v3035_v45 = vsel %vm831_vm4, %v4284_v44, 0.0 }
0x1372   : > { %v2997_v37 = vpop.f32.mrb[52].mxu1 }
0x1373   : > { %v3006_v38 = vmul.f32 0.5, %v2997_v37  ;;  %v4044_v39 = vpop.f32.mrb[53].mxu1 }
0x1374   : > { %v3000_v40 = vpop.f32.mrb[54].mxu1 }
0x1375   : > { %v3007_v41 = vmul.f32 0.5, %v3000_v40  ;;  %v4045_v42 = vpop.f32.mrb[55].mxu1  ;;  %v3014_v2 = vsel %vm831_vm4, %v3006_v38, -inf }
0x1376   : > { %3015 = vmax.xlane.f32.xlu0 %v3014_v2 }
0x1377   : > { %v3017_v43 = vsel %vm831_vm4, %v3007_v41, -inf }
0x137a   : > { %3018 = vmax.xlane.f32.xlu0 %v3017_v43 }
0x137e   : > { %3036 = vadd.xlane.f32.xlu0 %v3035_v45 }
0x13c9   : > { %v3034_v57 = vpop.xlane.xlu1 %3033 }
0x1403   : > { %v3016_v46 = vpop.xlane.xlu0 %3015 }
0x1404   : > { %v3022_v47 = vsub.f32 %v3006_v38, %v3016_v46 }
0x1406   : > { %v3028_v48 = vmul.f32 1.442695, %v3022_v47 }
0x1407   : > { %v3019_v49 = vpop.xlane.xlu0 %3018 }
0x1408   : > { %4285 = vpow2.f32 %v3028_v48  ;;  %v3023_v50 = vsub.f32 %v3007_v41, %v3019_v49 }
0x140a   : > { %v3030_v51 = vmul.f32 1.442695, %v3023_v50 }
0x140b   : > { %v3037_v56 = vpop.xlane.xlu0 %3036 }
0x140c   : > { %4287 = vpow2.f32 %v3030_v51 }
0x140d   : > { %4289 = vrcp.f32 %v3037_v56 }
0x140e   : > { %4291 = vrcp.f32 %v3034_v57 }
0x1412   : > { %v4286_v52 = vpop.eup %4285 }
0x1413   : > { %v3038_v53 = vsel %vm831_vm4, %v4286_v52, 0.0 }
0x1414   : > { %3039 = vadd.xlane.f32.xlu1 %v3038_v53 }
0x1416   : > { %v4288_v54 = vpop.eup %4287 }
0x1417   : > { %v3041_v55 = vsel %vm831_vm4, %v4288_v54, 0.0  ;;  %v4290_v58 = vpop.eup %4289 }
0x1418   : > { %3042 = vadd.xlane.f32.xlu0 %v3041_v55  ;;  %v4292_v60 = vpop.eup %4291  ;;  %v3049_v61 = vmul.f32 %v4290_v58, %v4284_v44 }
0x1419   : > { %v3048_v62 = vmul.f32 %v4292_v60, %v4282_v29 }
0x141b   : > { %v3052_v4 = vpack.c.bf16 %v3049_v61, %v3048_v62  ;;  %v4155_v61 = vld [vmem:[%s4451_s15] sm:$0xff]   ;;  %v4156_v62 = vld [vmem:[%s4451_s15 + $0x8] sm:$0xff]  }
0x1425   : > { %3054 = vrot.lane.b32.xlu1 %v4533_v8, %s4341_s18 }
0x142e   : > { %3101 = vrot.lane.b32.xlu0 %v4531_v6, %s4341_s18 }
0x14a1   : > { %v3040_v59 = vpop.xlane.xlu1 %3039 }
0x14a2   : > { %4293 = vrcp.f32 %v3040_v59 }
0x14a5   : > { %v3043_v0 = vpop.xlane.xlu0 %3042  ;;  %v3055_v1 = vpop.permute.xlu1 %3054 }
0x14a6   : > { %4295 = vrcp.f32 %v3043_v0  ;;  %4047 = vmatpush3.bf16.msra.mxu0 %v3055_v1  ;;  %v4157_v0 = vld [vmem:[%s4465_s27] sm:$0xff]  }
0x14a7   : > { %4064 = vmatprep.subr.bf16.mxu0 %v4155_v61 }
0x14a9   : > { %v3102_v7 = vpop.permute.xlu0 %3101  ;;  %4049 = vmatmul.mubr.msk.bf16.vlgmr.msra.gmra.mrb[72].mxu0 %vm831_vm4, %v3052_v4 }
0x14aa   : > { %4053 = vmatpush3.bf16.msra.mxu1 %v3102_v7  ;;  %4065 = vmatpush3.bf16.msra.mxu0 %v4155_v61 }
0x14ab   : > { %4119 = vmatprep.subr.msk.bf16.mxu1 %vm1231_vm5, %v3690_v12  ;;  %4066 = vmatprep.subr.bf16.mxu0 %v4156_v62 }
0x14ac   : > { %v4294_v6 = vpop.eup %4293 }
0x14ad   : > { %v3050_v9 = vmul.f32 %v4294_v6, %v4286_v52 }
0x14ae   : > { %4067 = vmatpush3.bf16.msra.mxu0 %v4156_v62 }
0x14af   : > { %4072 = vmatprep.subr.bf16.mxu0 %v4157_v0 }
0x14b0   : > { %v4296_v8 = vpop.eup %4295 }
0x14b1   : > { %v3051_v10 = vmul.f32 %v4296_v8, %v4288_v54 }
0x14b3   : > { %v3053_v11 = vpack.c.bf16 %v3051_v10, %v3050_v9 }
0x14b5   : > { %4055 = vmatmul.mubr.msk.bf16.vlgmr.msra.gmra.mrb[56].mxu1 %vm831_vm4, %v3053_v11 }
0x14b6   : > { %4059 = vmatpush3.bf16.msra.mxu1 %v3159_v13 }
0x157c   : > { %v3094_v14 = vpop.f32.mrb[72].mxu0 }
0x157d   : > { %v4050_v16 = vpop.f32.mrb[73].mxu0 }
0x157e   : > { %v3097_v15 = vpop.f32.mrb[74].mxu0 }
0x157f   : > { %v3148_v17 = vpack.c.bf16 %v3097_v15, %v3094_v14  ;;  %v4051_v33 = vpop.f32.mrb[75].mxu0 }
0x1581   : > { %4060 = vmatprep.mubr.msk.bf16.mxu1 %vm729_vm3, %v3148_v17  ;;  %v3694_v17 = vld [vmem:[%s4975_s20] ss:$0 sm:$0xff] }
0x1588   : > { %v3141_v35 = vpop.f32.mrb[56].mxu1 }
0x1589   : > { %v4056_v36 = vpop.f32.mrb[57].mxu1 }
0x158a   : > { %v3144_v18 = vpop.f32.mrb[58].mxu1 }
0x158b   : > { %v3149_v63 = vpack.c.bf16 %v3144_v18, %v3141_v35  ;;  %v4057_v3 = vpop.f32.mrb[59].mxu1 }
0x158c   : > { %v3695_v3 = vld [vmem:[%s540_s21] ss:$0 sm:$0xff] }
0x158d   : > { %4061 = vmatmul.mubr.msk.bf16.vlgmr.msra.gmra.mrb[20].mxu1 %vm729_vm3, %v3149_v63 }
0x1660   : > { %v4062_v5 = vpop.f32.mrb[20].mxu1 }
0x1661   : > { %v3195_v20 = vpop.f32.mrb[21].mxu1  ;;  %v3216_v22 = vadd.f32 %v4305_v21, %v4062_v5 }
0x1662   : > { %v3214_v24 = vadd.f32 %v4306_v23, %v3195_v20  ;;  %v4063_v25 = vpop.f32.mrb[22].mxu1 }
0x1663   : > { %v3198_v26 = vpop.f32.mrb[23].mxu1  ;;  %v3217_v29 = vadd.f32 %v4307_v28, %v4063_v25  ;;  %v4877_v32 = vadd.f32 %v3693_v19, %v3216_v22 }
0x1664   : > { %v4869_v27 = vadd.f32 %v3693_v19, %v3214_v24  ;;  %v3215_v31 = vadd.f32 %v4308_v30, %v3198_v26 }
0x1665   : > { %v4883_v38 = vadd.f32 %v3693_v19, %v3217_v29  ;;  %v3237_v40 = vsel %vm577_vm1, %v4877_v32, 0.0 }
0x1666   : > { %v4879_v34 = vadd.f32 %v3693_v19, %v3215_v31  ;;  %v3231_v37 = vsel %vm577_vm1, %v4869_v27, 0.0  ;;  %v4158_v31 = vld [vmem:[%s4465_s27 + $0x8] sm:$0xff]  }
0x1667   : > { %3232 = vadd.xlane.f32.xlu1 %v3231_v37  ;;  %v3240_v41 = vsel %vm577_vm1, %v4883_v38, 0.0  ;;  %v4159_v37 = vld [vmem:[%s4465_s27 + $0x10] sm:$0xff]  }
0x1668   : > { %v3234_v39 = vsel %vm577_vm1, %v4879_v34, 0.0 }
0x1669   : > { %3235 = vadd.xlane.f32.xlu0 %v3234_v39  ;;  %v4160_v39 = vld [vmem:[%s4465_s27 + $0x18] sm:$0xff]  }
0x166b   : > { %3238 = vadd.xlane.f32.xlu1 %v3237_v40  ;;  %v3696_v40 = vld [vmem:[%s548_s3] ss:$0 sm:$0xff] }
0x166d   : > { %3241 = vadd.xlane.f32.xlu0 %v3240_v41 }
0x16f4   : > { %v3233_v42 = vpop.xlane.xlu1 %3232 }
0x16f5   : > { %v3243_v2 = vmul.f32 0.03125, %v3233_v42 }
0x16f6   : > { %v3236_v43 = vpop.xlane.xlu0 %3235 }
0x16f7   : > { %v3247_v44 = vsub.f32 %v4869_v27, %v3243_v2  ;;  %v3244_v45 = vmul.f32 0.03125, %v3236_v43 }
0x16f8   : > { %v3239_v46 = vpop.xlane.xlu1 %3238 }
0x16f9   : > { %v3248_v47 = vsub.f32 %v4879_v34, %v3244_v45  ;;  %v3245_v48 = vmul.f32 0.03125, %v3239_v46  ;;  %v3251_v49 = vmul.f32 %v3247_v44, %v3247_v44 }
0x16fa   : > { %v3242_v50 = vpop.xlane.xlu0 %3241 }
0x16fb   : > { %v3249_v51 = vsub.f32 %v4877_v32, %v3245_v48  ;;  %v3246_v52 = vmul.f32 0.03125, %v3242_v50  ;;  %v3255_v53 = vsel %vm577_vm1, %v3251_v49, 0.0  ;;  %v3252_v54 = vmul.f32 %v3248_v47, %v3248_v47 }
0x16fc   : > { %3256 = vadd.xlane.f32.xlu1 %v3255_v53 }
0x16fd   : > { %v3250_v55 = vsub.f32 %v4883_v38, %v3246_v52  ;;  %v3258_v56 = vsel %vm577_vm1, %v3252_v54, 0.0  ;;  %v3253_v57 = vmul.f32 %v3249_v51, %v3249_v51  ;;  %v3701_v54 = vld [vmem:[%s556_s5] ss:$0 sm:$0xff] }
0x16fe   : > { %3259 = vadd.xlane.f32.xlu0 %v3258_v56 }
0x16ff   : > { %v3261_v58 = vsel %vm577_vm1, %v3253_v57, 0.0  ;;  %v3254_v59 = vmul.f32 %v3250_v55, %v3250_v55 }
0x1700   : > { %3262 = vadd.xlane.f32.xlu1 %v3261_v58 }
0x1701   : > { %v3264_v60 = vsel %vm577_vm1, %v3254_v59, 0.0 }
0x1702   : > { %3265 = vadd.xlane.f32.xlu0 %v3264_v60 }
0x1789   : > { %v3257_v1 = vpop.xlane.xlu1 %3256 }
0x178a   : > { %v3267_v4 = vmul.f32 0.03125, %v3257_v1 }
0x178b   : > { %v3260_v7 = vpop.xlane.xlu0 %3259 }
0x178c   : > { %v3271_v6 = vadd.f32 1e-05, %v3267_v4  ;;  %v3268_v8 = vmul.f32 0.03125, %v3260_v7 }
0x178d   : > { %v3263_v9 = vpop.xlane.xlu1 %3262 }
0x178e   : > { %4297 = vrsqrt.f32 %v3271_v6  ;;  %v3272_v10 = vadd.f32 1e-05, %v3268_v8  ;;  %v3269_v11 = vmul.f32 0.03125, %v3263_v9 }
0x178f   : > { %v3266_v12 = vpop.xlane.xlu0 %3265 }
0x1790   : > { %4299 = vrsqrt.f32 %v3272_v10  ;;  %v3273_v13 = vadd.f32 1e-05, %v3269_v11  ;;  %v3270_v14 = vmul.f32 0.03125, %v3266_v12 }
0x1792   : > { %4301 = vrsqrt.f32 %v3273_v13  ;;  %v3274_v16 = vadd.f32 1e-05, %v3270_v14 }
0x1794   : > { %4303 = vrsqrt.f32 %v3274_v16 }
0x1798   : > { %v4298_v15 = vpop.eup %4297 }
0x1799   : > { %v3279_v33 = vmul.f32 %v4298_v15, %v3247_v44 }
0x179a   : > { %v4300_v35 = vpop.eup %4299 }
0x179b   : > { %v3280_v36 = vmul.f32 %v4300_v35, %v3248_v47  ;;  %v3289_v18 = vmul.f32 %v3694_v17, %v3279_v33 }
0x179c   : > { %v4302_v63 = vpop.eup %4301 }
0x179d   : > { %v3281_v5 = vmul.f32 %v4302_v63, %v3249_v51  ;;  %v3290_v19 = vmul.f32 %v3694_v17, %v3280_v36  ;;  %v3299_v23 = vadd.f32 %v3695_v3, %v3289_v18 }
0x179e   : > { %v4304_v20 = vpop.eup %4303 }
0x179f   : > { %v3291_v21 = vmul.f32 %v3694_v17, %v3281_v5  ;;  %v3282_v22 = vmul.f32 %v4304_v20, %v3250_v55  ;;  %v3300_v24 = vadd.f32 %v3695_v3, %v3290_v19 }
0x17a1   : > { %v3292_v25 = vmul.f32 %v3694_v17, %v3282_v22  ;;  %v3303_v26 = vpack.c.bf16 %v3300_v24, %v3299_v23  ;;  %v3301_v28 = vadd.f32 %v3695_v3, %v3291_v21 }
0x17a3   : > { %4068 = vmatprep.mubr.msk.bf16.mxu0 %vm577_vm1, %v3303_v26  ;;  %v3302_v29 = vadd.f32 %v3695_v3, %v3292_v25 }
0x17a5   : > { %v3304_v30 = vpack.c.bf16 %v3302_v29, %v3301_v28 }
0x17a7   : > { %4069 = vmatmul.mubr.msk.bf16.vlgmr.msra.gmra.mrb[76].mxu0 %vm577_vm1, %v3304_v30 }
0x17a8   : > { %4073 = vmatpush3.bf16.msra.mxu0 %v4157_v0 }
0x17a9   : > { %4074 = vmatprep.subr.bf16.mxu0 %v4158_v31 }
0x17ac   : > { %4075 = vmatpush3.bf16.msra.mxu0 %v4158_v31 }
0x17ad   : > { %4076 = vmatprep.subr.bf16.mxu0 %v4159_v37 }
0x17b0   : > { %4077 = vmatpush3.bf16.msra.mxu0 %v4159_v37 }
0x17b1   : > { %4078 = vmatprep.subr.bf16.mxu0 %v4160_v39 }
0x17b4   : > { %4079 = vmatpush3.bf16.msra.mxu0 %v4160_v39 }
0x187a   : > { %v4070_v41 = vpop.f32.mrb[76].mxu0 }
0x187b   : > { %v3377_v42 = vadd.f32 %v4070_v41, %v3696_v40  ;;  %v3368_v2 = vpop.f32.mrb[77].mxu0 }
0x187c   : > { %v3369_v43 = vadd.f32 %v3696_v40, %v3368_v2  ;;  %v4071_v44 = vpop.f32.mrb[78].mxu0 }
0x187d   : > { %v3380_v45 = vadd.f32 %v4071_v44, %v3696_v40  ;;  %v3371_v46 = vpop.f32.mrb[79].mxu0  ;;  %v3385_v48 = vmax.f32 %v3377_v42, 0.0 }
0x187e   : > { %v3372_v47 = vadd.f32 %v3696_v40, %v3371_v46  ;;  %v3383_v50 = vmax.f32 %v3369_v43, 0.0 }
0x187f   : > { %v3386_v49 = vmax.f32 %v3380_v45, 0.0 }
0x1880   : > { %v3384_v51 = vmax.f32 %v3372_v47, 0.0 }
0x1881   : > { %v3388_v52 = vpack.c.bf16 %v3386_v49, %v3385_v48 }
0x1882   : > { %v3387_v53 = vpack.c.bf16 %v3384_v51, %v3383_v50 }
0x1884   : > { %4080 = vmatprep.mubr.msk.bf16.mxu0 %vm3428_vm6, %v3387_v53 }
0x1885   : > { %4081 = vmatmul.mubr.msk.bf16.vlgmr.msra.gmra.mrb[80].mxu0 %vm3428_vm6, %v3388_v52 }
0x1958   : > { %v4082_v55 = vpop.f32.mrb[80].mxu0 }
0x1959   : > { %v3478_v56 = vadd.f32 %v4082_v55, %v3701_v54  ;;  %v3469_v57 = vpop.f32.mrb[81].mxu0 }
0x195a   : > { %v3470_v58 = vadd.f32 %v3701_v54, %v3469_v57  ;;  %v4083_v59 = vpop.f32.mrb[82].mxu0 }
0x195b   : > { %v3486_v60 = vadd.f32 %v3478_v56, %v4877_v32  ;;  %v3481_v61 = vadd.f32 %v4083_v59, %v3701_v54  ;;  %v3472_v62 = vpop.f32.mrb[83].mxu0 }
0x195c   : > { %v3484_v0 = vadd.f32 %v3470_v58, %v4869_v27  ;;  %v3473_v1 = vadd.f32 %v3701_v54, %v3472_v62 }
0x195d   : > { %3490 = vst.msk [vmem:[%s4962_s12 + $0x10] sm:$0xff] %vm577_vm1, %v3486_v60  ;;  %v3487_v4 = vadd.f32 %v3481_v61, %v4883_v38 }
0x195e   : > { %3488 = vst.msk [vmem:[%s4962_s12] sm:$0xff] %vm577_vm1, %v3484_v0  ;;  %v3485_v7 = vadd.f32 %v3473_v1, %v4879_v34 }
0x195f   : > { %3491 = vst.msk [vmem:[%s4962_s12 + $0x18] sm:$0xff] %vm577_vm1, %v3487_v4 }
0x1960   : > { %3489 = vst.msk [vmem:[%s4962_s12 + $0x8] sm:$0xff] %vm577_vm1, %v3485_v7 }
0x1961 PF: > { %s4976_s16 = sld [smem:[#allocation2_spill]] }
0x1967   : > { %s22_s21 = sadd.s32 1, %s4976_s16  }
0x1968   : > { %p19_p5 = scmp.ge.s32.totalorder %s22_s21, 4  }
0x196a   :  { %21 = sbr.rel (!%p19_p5) target bundleno = 4 (0x4), region = 135 }

</bundles_post_ra>
